<compile_context>
chip_gen: v7x
topology: tpu7x:2x2x1
jax: 0.10.0
libtpu: 0.0.40
codegen_flags: <defaults>
</compile_context>

<pallas_src>
import jax
import jax.numpy as jnp
from jax.experimental import pallas as pl
from jax.experimental.pallas import tpu as pltpu


def _round_up(n, m):
    return ((n + m - 1) // m) * m


def _aae_kernel(x_ref,
                ew1, eb1, ew2, eb2, ew3, eb3,     # encoder
                dw1, db1, dw2, db2, dw3, db3,     # decoder
                gw1, gb1, gw2, gb2, gw3, gb3,     # discriminator
                recon_ref, valid_ref):
    def linear(h, w_ref, b_ref):
        # bf16 MXU inputs, f32 accumulation; bias add in f32.
        return jnp.dot(h.astype(jnp.bfloat16), w_ref[...],
                       preferred_element_type=jnp.float32) + b_ref[...]

    def lrelu(h):
        return jnp.maximum(h, 0.2 * h)

    x = x_ref[...]

    # Encoder -> latent z
    z = lrelu(linear(x, ew1, eb1))
    z = lrelu(linear(z, ew2, eb2))
    z = linear(z, ew3, eb3)

    # Decoder -> reconstruction
    r = lrelu(linear(z, dw1, db1))
    r = lrelu(linear(r, dw2, db2))
    r = linear(r, dw3, db3)
    recon_ref[...] = r.astype(recon_ref.dtype)

    # Discriminator -> validity
    v = lrelu(linear(z, gw1, gb1))
    v = lrelu(linear(v, gw2, gb2))
    v = linear(v, gw3, gb3)
    valid_ref[...] = v.astype(valid_ref.dtype)


_LAYER_NAMES = ["enc1", "enc2", "enc3", "dec1", "dec2", "dec3",
                "dis1", "dis2", "dis3"]


def adv_autoencoder_forward(x, params, *, tile_b=512):
    """x: (B, input_size) f32. Returns (reconstructed (B, output_size),
    validity (B, latent_dim)), both f32."""
    B, input_size = x.shape
    latent_dim = params["enc3_w"].shape[1]
    output_size = params["dec3_w"].shape[1]

    # --- pad feature dims to lane width (128) and batch to the tile size ---
    in_p = _round_up(input_size, 128)
    out_p = _round_up(output_size, 128)
    lat_p = _round_up(latent_dim, 128)

    b8 = _round_up(max(B, 8), 8)
    if b8 <= tile_b:
        tb, B_pad = b8, b8
    else:
        tb = tile_b
        B_pad = _round_up(B, tb)

    x_p = jnp.pad(x.astype(jnp.float32),
                  ((0, B_pad - B), (0, in_p - input_size)))

    def prep(w, b):
        ip = _round_up(w.shape[0], 128)
        op = _round_up(w.shape[1], 128)
        wp = jnp.pad(w, ((0, ip - w.shape[0]), (0, op - w.shape[1])))
        bp = jnp.pad(b, (0, op - b.shape[0])).reshape(1, op)
        return wp.astype(jnp.bfloat16), bp.astype(jnp.float32)

    flat_wb = []
    for name in _LAYER_NAMES:
        wp, bp = prep(params[f"{name}_w"], params[f"{name}_b"])
        flat_wb += [wp, bp]

    # --- BlockSpecs ---
    def resident(shape):
        return pl.BlockSpec(shape, lambda i, _n=len(shape): (0,) * _n)

    x_spec = pl.BlockSpec((tb, in_p), lambda i: (i, 0))
    wb_specs = [resident(a.shape) for a in flat_wb]
    recon_spec = pl.BlockSpec((tb, out_p), lambda i: (i, 0))
    valid_spec = pl.BlockSpec((tb, lat_p), lambda i: (i, 0))

    recon_p, valid_p = pl.pallas_call(
        _aae_kernel,
        out_shape=(jax.ShapeDtypeStruct((B_pad, out_p), jnp.float32),
                   jax.ShapeDtypeStruct((B_pad, lat_p), jnp.float32)),
        grid_spec=pltpu.PrefetchScalarGridSpec(
            num_scalar_prefetch=0,
            grid=(B_pad // tb,),
            in_specs=[x_spec] + wb_specs,
            out_specs=[recon_spec, valid_spec],
        ),
        compiler_params=pltpu.CompilerParams(
            dimension_semantics=("parallel",)),
    )(x_p, *flat_wb)

    return recon_p[:B, :output_size], valid_p[:B, :latent_dim]


def init_params(key, input_size, latent_dim, output_size):
    """Deterministic init mirroring nn.Linear's U(-1/sqrt(fan_in), 1/sqrt(fan_in))."""
    dims = {
        "enc1": (input_size, 128), "enc2": (128, 64), "enc3": (64, latent_dim),
        "dec1": (latent_dim, 64), "dec2": (64, 128), "dec3": (128, output_size),
        "dis1": (latent_dim, 64), "dis2": (64, 32), "dis3": (32, latent_dim),
    }
    params = {}
    for name in _LAYER_NAMES:
        fan_in, fan_out = dims[name]
        key, kw, kb = jax.random.split(key, 3)
        bound = 1.0 / jnp.sqrt(fan_in)
        params[f"{name}_w"] = jax.random.uniform(
            kw, (fan_in, fan_out), jnp.float32, -bound, bound)
        params[f"{name}_b"] = jax.random.uniform(
            kb, (fan_out,), jnp.float32, -bound, bound)
    return params


def reference_forward(x, params):
    """Plain-JAX reference using the same bf16-input / f32-accumulate matmuls."""
    def lin(h, w, b):
        return jnp.dot(h.astype(jnp.bfloat16), w.astype(jnp.bfloat16),
                       preferred_element_type=jnp.float32) + b

    lrelu = lambda v: jnp.maximum(v, 0.2 * v)

    z = lrelu(lin(x, params["enc1_w"], params["enc1_b"]))
    z = lrelu(lin(z, params["enc2_w"], params["enc2_b"]))
    z = lin(z, params["enc3_w"], params["enc3_b"])

    r = lrelu(lin(z, params["dec1_w"], params["dec1_b"]))
    r = lrelu(lin(r, params["dec2_w"], params["dec2_b"]))
    r = lin(r, params["dec3_w"], params["dec3_b"])

    v = lrelu(lin(z, params["dis1_w"], params["dis1_b"]))
    v = lrelu(lin(v, params["dis2_w"], params["dis2_b"]))
    v = lin(v, params["dis3_w"], params["dis3_b"])
    return r, v


if __name__ == "__main__":
    batch = 16
    input_size = 32
    latent_dim = 16
    output_size = 32

    key = jax.random.PRNGKey(0)
    key, kx = jax.random.split(key)
    x = jax.random.normal(kx, (batch, input_size), jnp.float32)
    params = init_params(key, input_size, latent_dim, output_size)

    recon, valid = adv_autoencoder_forward(x, params)
    recon = jax.block_until_ready(recon)
    valid = jax.block_until_ready(valid)

    recon_ref, valid_ref = reference_forward(x, params)

    assert recon.shape == (batch, output_size)
    assert valid.shape == (batch, latent_dim)
    assert jnp.allclose(recon, recon_ref, atol=1e-3, rtol=1e-3), "recon mismatch"
    assert jnp.allclose(valid, valid_ref, atol=1e-3, rtol=1e-3), "validity mismatch"

    print("KERNEL_OK")
</pallas_src>

<mosaic_0001>
module attributes {stable_mosaic.version = 11 : i64} {
  func.func @_aae_kernel(%arg0: i32, %arg1: memref<16x128xf32, #tpu.memory_space<vmem>>, %arg2: memref<128x128xbf16, #tpu.memory_space<vmem>>, %arg3: memref<1x128xf32, #tpu.memory_space<vmem>>, %arg4: memref<128x128xbf16, #tpu.memory_space<vmem>>, %arg5: memref<1x128xf32, #tpu.memory_space<vmem>>, %arg6: memref<128x128xbf16, #tpu.memory_space<vmem>>, %arg7: memref<1x128xf32, #tpu.memory_space<vmem>>, %arg8: memref<128x128xbf16, #tpu.memory_space<vmem>>, %arg9: memref<1x128xf32, #tpu.memory_space<vmem>>, %arg10: memref<128x128xbf16, #tpu.memory_space<vmem>>, %arg11: memref<1x128xf32, #tpu.memory_space<vmem>>, %arg12: memref<128x128xbf16, #tpu.memory_space<vmem>>, %arg13: memref<1x128xf32, #tpu.memory_space<vmem>>, %arg14: memref<128x128xbf16, #tpu.memory_space<vmem>>, %arg15: memref<1x128xf32, #tpu.memory_space<vmem>>, %arg16: memref<128x128xbf16, #tpu.memory_space<vmem>>, %arg17: memref<1x128xf32, #tpu.memory_space<vmem>>, %arg18: memref<128x128xbf16, #tpu.memory_space<vmem>>, %arg19: memref<1x128xf32, #tpu.memory_space<vmem>>, %arg20: memref<16x128xf32, #tpu.memory_space<vmem>>, %arg21: memref<16x128xf32, #tpu.memory_space<vmem>>) attributes {dimension_semantics = [#tpu.dimension_semantics<parallel>], iteration_bounds = array<i64: 1>, scalar_prefetch = 0 : i64, scratch_operands = 0 : i64, tpu.core_type = #tpu.core_type<tc>, window_params = [{transform_indices = @transform_0, window_bounds = array<i64: 16, 128>}, {pipeline_mode = #tpu.pipeline_mode<synchronous>, transform_indices = @transform_1, window_bounds = array<i64: 128, 128>}, {pipeline_mode = #tpu.pipeline_mode<synchronous>, transform_indices = @transform_2, window_bounds = array<i64: 1, 128>}, {pipeline_mode = #tpu.pipeline_mode<synchronous>, transform_indices = @transform_3, window_bounds = array<i64: 128, 128>}, {pipeline_mode = #tpu.pipeline_mode<synchronous>, transform_indices = @transform_4, window_bounds = array<i64: 1, 128>}, {pipeline_mode = #tpu.pipeline_mode<synchronous>, transform_indices = @transform_5, window_bounds = array<i64: 128, 128>}, {pipeline_mode = #tpu.pipeline_mode<synchronous>, transform_indices = @transform_6, window_bounds = array<i64: 1, 128>}, {pipeline_mode = #tpu.pipeline_mode<synchronous>, transform_indices = @transform_7, window_bounds = array<i64: 128, 128>}, {pipeline_mode = #tpu.pipeline_mode<synchronous>, transform_indices = @transform_8, window_bounds = array<i64: 1, 128>}, {pipeline_mode = #tpu.pipeline_mode<synchronous>, transform_indices = @transform_9, window_bounds = array<i64: 128, 128>}, {pipeline_mode = #tpu.pipeline_mode<synchronous>, transform_indices = @transform_10, window_bounds = array<i64: 1, 128>}, {pipeline_mode = #tpu.pipeline_mode<synchronous>, transform_indices = @transform_11, window_bounds = array<i64: 128, 128>}, {pipeline_mode = #tpu.pipeline_mode<synchronous>, transform_indices = @transform_12, window_bounds = array<i64: 1, 128>}, {pipeline_mode = #tpu.pipeline_mode<synchronous>, transform_indices = @transform_13, window_bounds = array<i64: 128, 128>}, {pipeline_mode = #tpu.pipeline_mode<synchronous>, transform_indices = @transform_14, window_bounds = array<i64: 1, 128>}, {pipeline_mode = #tpu.pipeline_mode<synchronous>, transform_indices = @transform_15, window_bounds = array<i64: 128, 128>}, {pipeline_mode = #tpu.pipeline_mode<synchronous>, transform_indices = @transform_16, window_bounds = array<i64: 1, 128>}, {pipeline_mode = #tpu.pipeline_mode<synchronous>, transform_indices = @transform_17, window_bounds = array<i64: 128, 128>}, {pipeline_mode = #tpu.pipeline_mode<synchronous>, transform_indices = @transform_18, window_bounds = array<i64: 1, 128>}, {transform_indices = @transform_19, window_bounds = array<i64: 16, 128>}, {transform_indices = @transform_20, window_bounds = array<i64: 16, 128>}]} {
    %c0 = arith.constant 0 : index
    %c0_0 = arith.constant 0 : index
    %0 = vector.load %arg1[%c0, %c0_0] : memref<16x128xf32, #tpu.memory_space<vmem>>, vector<16x128xf32>
    %1 = arith.truncf %0 : vector<16x128xf32> to vector<16x128xbf16>
    %c0_1 = arith.constant 0 : index
    %c0_2 = arith.constant 0 : index
    %2 = vector.load %arg2[%c0_1, %c0_2] : memref<128x128xbf16, #tpu.memory_space<vmem>>, vector<128x128xbf16>
    %cst = arith.constant dense<0.000000e+00> : vector<16x128xf32>
    %3 = tpu.matmul %1, %2, %cst {dimension_numbers = #tpu.dot_dimension_numbers<[1], [0], [0], [1], [0, 0, 1, 1], [], []>} : vector<16x128xbf16>, vector<128x128xbf16>, vector<16x128xf32> -> vector<16x128xf32>
    %c0_3 = arith.constant 0 : index
    %c0_4 = arith.constant 0 : index
    %4 = vector.load %arg3[%c0_3, %c0_4] : memref<1x128xf32, #tpu.memory_space<vmem>>, vector<1x128xf32>
    %5 = vector.broadcast %4 : vector<1x128xf32> to vector<16x128xf32>
    %6 = arith.addf %3, %5 : vector<16x128xf32>
    %cst_5 = arith.constant 2.000000e-01 : f32
    %7 = vector.broadcast %cst_5 : f32 to vector<16x128xf32>
    %8 = arith.mulf %7, %6 : vector<16x128xf32>
    %9 = arith.maximumf %6, %8 : vector<16x128xf32>
    %10 = arith.truncf %9 : vector<16x128xf32> to vector<16x128xbf16>
    %c0_6 = arith.constant 0 : index
    %c0_7 = arith.constant 0 : index
    %11 = vector.load %arg4[%c0_6, %c0_7] : memref<128x128xbf16, #tpu.memory_space<vmem>>, vector<128x128xbf16>
    %cst_8 = arith.constant dense<0.000000e+00> : vector<16x128xf32>
    %12 = tpu.matmul %10, %11, %cst_8 {dimension_numbers = #tpu.dot_dimension_numbers<[1], [0], [0], [1], [0, 0, 1, 1], [], []>} : vector<16x128xbf16>, vector<128x128xbf16>, vector<16x128xf32> -> vector<16x128xf32>
    %c0_9 = arith.constant 0 : index
    %c0_10 = arith.constant 0 : index
    %13 = vector.load %arg5[%c0_9, %c0_10] : memref<1x128xf32, #tpu.memory_space<vmem>>, vector<1x128xf32>
    %14 = vector.broadcast %13 : vector<1x128xf32> to vector<16x128xf32>
    %15 = arith.addf %12, %14 : vector<16x128xf32>
    %cst_11 = arith.constant 2.000000e-01 : f32
    %16 = vector.broadcast %cst_11 : f32 to vector<16x128xf32>
    %17 = arith.mulf %16, %15 : vector<16x128xf32>
    %18 = arith.maximumf %15, %17 : vector<16x128xf32>
    %19 = arith.truncf %18 : vector<16x128xf32> to vector<16x128xbf16>
    %c0_12 = arith.constant 0 : index
    %c0_13 = arith.constant 0 : index
    %20 = vector.load %arg6[%c0_12, %c0_13] : memref<128x128xbf16, #tpu.memory_space<vmem>>, vector<128x128xbf16>
    %cst_14 = arith.constant dense<0.000000e+00> : vector<16x128xf32>
    %21 = tpu.matmul %19, %20, %cst_14 {dimension_numbers = #tpu.dot_dimension_numbers<[1], [0], [0], [1], [0, 0, 1, 1], [], []>} : vector<16x128xbf16>, vector<128x128xbf16>, vector<16x128xf32> -> vector<16x128xf32>
    %c0_15 = arith.constant 0 : index
    %c0_16 = arith.constant 0 : index
    %22 = vector.load %arg7[%c0_15, %c0_16] : memref<1x128xf32, #tpu.memory_space<vmem>>, vector<1x128xf32>
    %23 = vector.broadcast %22 : vector<1x128xf32> to vector<16x128xf32>
    %24 = arith.addf %21, %23 : vector<16x128xf32>
    %25 = arith.truncf %24 : vector<16x128xf32> to vector<16x128xbf16>
    %c0_17 = arith.constant 0 : index
    %c0_18 = arith.constant 0 : index
    %26 = vector.load %arg8[%c0_17, %c0_18] : memref<128x128xbf16, #tpu.memory_space<vmem>>, vector<128x128xbf16>
    %cst_19 = arith.constant dense<0.000000e+00> : vector<16x128xf32>
    %27 = tpu.matmul %25, %26, %cst_19 {dimension_numbers = #tpu.dot_dimension_numbers<[1], [0], [0], [1], [0, 0, 1, 1], [], []>} : vector<16x128xbf16>, vector<128x128xbf16>, vector<16x128xf32> -> vector<16x128xf32>
    %c0_20 = arith.constant 0 : index
    %c0_21 = arith.constant 0 : index
    %28 = vector.load %arg9[%c0_20, %c0_21] : memref<1x128xf32, #tpu.memory_space<vmem>>, vector<1x128xf32>
    %29 = vector.broadcast %28 : vector<1x128xf32> to vector<16x128xf32>
    %30 = arith.addf %27, %29 : vector<16x128xf32>
    %cst_22 = arith.constant 2.000000e-01 : f32
    %31 = vector.broadcast %cst_22 : f32 to vector<16x128xf32>
    %32 = arith.mulf %31, %30 : vector<16x128xf32>
    %33 = arith.maximumf %30, %32 : vector<16x128xf32>
    %34 = arith.truncf %33 : vector<16x128xf32> to vector<16x128xbf16>
    %c0_23 = arith.constant 0 : index
    %c0_24 = arith.constant 0 : index
    %35 = vector.load %arg10[%c0_23, %c0_24] : memref<128x128xbf16, #tpu.memory_space<vmem>>, vector<128x128xbf16>
    %cst_25 = arith.constant dense<0.000000e+00> : vector<16x128xf32>
    %36 = tpu.matmul %34, %35, %cst_25 {dimension_numbers = #tpu.dot_dimension_numbers<[1], [0], [0], [1], [0, 0, 1, 1], [], []>} : vector<16x128xbf16>, vector<128x128xbf16>, vector<16x128xf32> -> vector<16x128xf32>
    %c0_26 = arith.constant 0 : index
    %c0_27 = arith.constant 0 : index
    %37 = vector.load %arg11[%c0_26, %c0_27] : memref<1x128xf32, #tpu.memory_space<vmem>>, vector<1x128xf32>
    %38 = vector.broadcast %37 : vector<1x128xf32> to vector<16x128xf32>
    %39 = arith.addf %36, %38 : vector<16x128xf32>
    %cst_28 = arith.constant 2.000000e-01 : f32
    %40 = vector.broadcast %cst_28 : f32 to vector<16x128xf32>
    %41 = arith.mulf %40, %39 : vector<16x128xf32>
    %42 = arith.maximumf %39, %41 : vector<16x128xf32>
    %43 = arith.truncf %42 : vector<16x128xf32> to vector<16x128xbf16>
    %c0_29 = arith.constant 0 : index
    %c0_30 = arith.constant 0 : index
    %44 = vector.load %arg12[%c0_29, %c0_30] : memref<128x128xbf16, #tpu.memory_space<vmem>>, vector<128x128xbf16>
    %cst_31 = arith.constant dense<0.000000e+00> : vector<16x128xf32>
    %45 = tpu.matmul %43, %44, %cst_31 {dimension_numbers = #tpu.dot_dimension_numbers<[1], [0], [0], [1], [0, 0, 1, 1], [], []>} : vector<16x128xbf16>, vector<128x128xbf16>, vector<16x128xf32> -> vector<16x128xf32>
    %c0_32 = arith.constant 0 : index
    %c0_33 = arith.constant 0 : index
    %46 = vector.load %arg13[%c0_32, %c0_33] : memref<1x128xf32, #tpu.memory_space<vmem>>, vector<1x128xf32>
    %47 = vector.broadcast %46 : vector<1x128xf32> to vector<16x128xf32>
    %48 = arith.addf %45, %47 : vector<16x128xf32>
    %c0_34 = arith.constant 0 : index
    %c0_35 = arith.constant 0 : index
    %49 = vector.load %arg20[%c0_34, %c0_35] : memref<16x128xf32, #tpu.memory_space<vmem>>, vector<16x128xf32>
    tpu.vector_store %arg20[%c0_34, %c0_35], %48 {strides = array<i32>} : memref<16x128xf32, #tpu.memory_space<vmem>>, vector<16x128xf32>,
    %50 = arith.truncf %24 : vector<16x128xf32> to vector<16x128xbf16>
    %c0_36 = arith.constant 0 : index
    %c0_37 = arith.constant 0 : index
    %51 = vector.load %arg14[%c0_36, %c0_37] : memref<128x128xbf16, #tpu.memory_space<vmem>>, vector<128x128xbf16>
    %cst_38 = arith.constant dense<0.000000e+00> : vector<16x128xf32>
    %52 = tpu.matmul %50, %51, %cst_38 {dimension_numbers = #tpu.dot_dimension_numbers<[1], [0], [0], [1], [0, 0, 1, 1], [], []>} : vector<16x128xbf16>, vector<128x128xbf16>, vector<16x128xf32> -> vector<16x128xf32>
    %c0_39 = arith.constant 0 : index
    %c0_40 = arith.constant 0 : index
    %53 = vector.load %arg15[%c0_39, %c0_40] : memref<1x128xf32, #tpu.memory_space<vmem>>, vector<1x128xf32>
    %54 = vector.broadcast %53 : vector<1x128xf32> to vector<16x128xf32>
    %55 = arith.addf %52, %54 : vector<16x128xf32>
    %cst_41 = arith.constant 2.000000e-01 : f32
    %56 = vector.broadcast %cst_41 : f32 to vector<16x128xf32>
    %57 = arith.mulf %56, %55 : vector<16x128xf32>
    %58 = arith.maximumf %55, %57 : vector<16x128xf32>
    %59 = arith.truncf %58 : vector<16x128xf32> to vector<16x128xbf16>
    %c0_42 = arith.constant 0 : index
    %c0_43 = arith.constant 0 : index
    %60 = vector.load %arg16[%c0_42, %c0_43] : memref<128x128xbf16, #tpu.memory_space<vmem>>, vector<128x128xbf16>
    %cst_44 = arith.constant dense<0.000000e+00> : vector<16x128xf32>
    %61 = tpu.matmul %59, %60, %cst_44 {dimension_numbers = #tpu.dot_dimension_numbers<[1], [0], [0], [1], [0, 0, 1, 1], [], []>} : vector<16x128xbf16>, vector<128x128xbf16>, vector<16x128xf32> -> vector<16x128xf32>
    %c0_45 = arith.constant 0 : index
    %c0_46 = arith.constant 0 : index
    %62 = vector.load %arg17[%c0_45, %c0_46] : memref<1x128xf32, #tpu.memory_space<vmem>>, vector<1x128xf32>
    %63 = vector.broadcast %62 : vector<1x128xf32> to vector<16x128xf32>
    %64 = arith.addf %61, %63 : vector<16x128xf32>
    %cst_47 = arith.constant 2.000000e-01 : f32
    %65 = vector.broadcast %cst_47 : f32 to vector<16x128xf32>
    %66 = arith.mulf %65, %64 : vector<16x128xf32>
    %67 = arith.maximumf %64, %66 : vector<16x128xf32>
    %68 = arith.truncf %67 : vector<16x128xf32> to vector<16x128xbf16>
    %c0_48 = arith.constant 0 : index
    %c0_49 = arith.constant 0 : index
    %69 = vector.load %arg18[%c0_48, %c0_49] : memref<128x128xbf16, #tpu.memory_space<vmem>>, vector<128x128xbf16>
    %cst_50 = arith.constant dense<0.000000e+00> : vector<16x128xf32>
    %70 = tpu.matmul %68, %69, %cst_50 {dimension_numbers = #tpu.dot_dimension_numbers<[1], [0], [0], [1], [0, 0, 1, 1], [], []>} : vector<16x128xbf16>, vector<128x128xbf16>, vector<16x128xf32> -> vector<16x128xf32>
    %c0_51 = arith.constant 0 : index
    %c0_52 = arith.constant 0 : index
    %71 = vector.load %arg19[%c0_51, %c0_52] : memref<1x128xf32, #tpu.memory_space<vmem>>, vector<1x128xf32>
    %72 = vector.broadcast %71 : vector<1x128xf32> to vector<16x128xf32>
    %73 = arith.addf %70, %72 : vector<16x128xf32>
    %c0_53 = arith.constant 0 : index
    %c0_54 = arith.constant 0 : index
    %74 = vector.load %arg21[%c0_53, %c0_54] : memref<16x128xf32, #tpu.memory_space<vmem>>, vector<16x128xf32>
    tpu.vector_store %arg21[%c0_53, %c0_54], %73 {strides = array<i32>} : memref<16x128xf32, #tpu.memory_space<vmem>>, vector<16x128xf32>,
    return
  }
  func.func @transform_0(%arg0: i32) -> (i32, i32) {
    %c0_i32 = arith.constant 0 : i32
    %c0_i32_0 = arith.constant 0 : i32
    return %arg0, %c0_i32 : i32, i32
  }
  func.func @transform_1(%arg0: i32) -> (i32, i32) {
    %c0_i32 = arith.constant 0 : i32
    %c0_i32_0 = arith.constant 0 : i32
    %c0_i32_1 = arith.constant 0 : i32
    return %c0_i32, %c0_i32_0 : i32, i32
  }
  func.func @transform_2(%arg0: i32) -> (i32, i32) {
    %c0_i32 = arith.constant 0 : i32
    %c0_i32_0 = arith.constant 0 : i32
    %c0_i32_1 = arith.constant 0 : i32
    return %c0_i32, %c0_i32_0 : i32, i32
  }
  func.func @transform_3(%arg0: i32) -> (i32, i32) {
    %c0_i32 = arith.constant 0 : i32
    %c0_i32_0 = arith.constant 0 : i32
    %c0_i32_1 = arith.constant 0 : i32
    return %c0_i32, %c0_i32_0 : i32, i32
  }
  func.func @transform_4(%arg0: i32) -> (i32, i32) {
    %c0_i32 = arith.constant 0 : i32
    %c0_i32_0 = arith.constant 0 : i32
    %c0_i32_1 = arith.constant 0 : i32
    return %c0_i32, %c0_i32_0 : i32, i32
  }
  func.func @transform_5(%arg0: i32) -> (i32, i32) {
    %c0_i32 = arith.constant 0 : i32
    %c0_i32_0 = arith.constant 0 : i32
    %c0_i32_1 = arith.constant 0 : i32
    return %c0_i32, %c0_i32_0 : i32, i32
  }
  func.func @transform_6(%arg0: i32) -> (i32, i32) {
    %c0_i32 = arith.constant 0 : i32
    %c0_i32_0 = arith.constant 0 : i32
    %c0_i32_1 = arith.constant 0 : i32
    return %c0_i32, %c0_i32_0 : i32, i32
  }
  func.func @transform_7(%arg0: i32) -> (i32, i32) {
    %c0_i32 = arith.constant 0 : i32
    %c0_i32_0 = arith.constant 0 : i32
    %c0_i32_1 = arith.constant 0 : i32
    return %c0_i32, %c0_i32_0 : i32, i32
  }
  func.func @transform_8(%arg0: i32) -> (i32, i32) {
    %c0_i32 = arith.constant 0 : i32
    %c0_i32_0 = arith.constant 0 : i32
    %c0_i32_1 = arith.constant 0 : i32
    return %c0_i32, %c0_i32_0 : i32, i32
  }
  func.func @transform_9(%arg0: i32) -> (i32, i32) {
    %c0_i32 = arith.constant 0 : i32
    %c0_i32_0 = arith.constant 0 : i32
    %c0_i32_1 = arith.constant 0 : i32
    return %c0_i32, %c0_i32_0 : i32, i32
  }
  func.func @transform_10(%arg0: i32) -> (i32, i32) {
    %c0_i32 = arith.constant 0 : i32
    %c0_i32_0 = arith.constant 0 : i32
    %c0_i32_1 = arith.constant 0 : i32
    return %c0_i32, %c0_i32_0 : i32, i32
  }
  func.func @transform_11(%arg0: i32) -> (i32, i32) {
    %c0_i32 = arith.constant 0 : i32
    %c0_i32_0 = arith.constant 0 : i32
    %c0_i32_1 = arith.constant 0 : i32
    return %c0_i32, %c0_i32_0 : i32, i32
  }
  func.func @transform_12(%arg0: i32) -> (i32, i32) {
    %c0_i32 = arith.constant 0 : i32
    %c0_i32_0 = arith.constant 0 : i32
    %c0_i32_1 = arith.constant 0 : i32
    return %c0_i32, %c0_i32_0 : i32, i32
  }
  func.func @transform_13(%arg0: i32) -> (i32, i32) {
    %c0_i32 = arith.constant 0 : i32
    %c0_i32_0 = arith.constant 0 : i32
    %c0_i32_1 = arith.constant 0 : i32
    return %c0_i32, %c0_i32_0 : i32, i32
  }
  func.func @transform_14(%arg0: i32) -> (i32, i32) {
    %c0_i32 = arith.constant 0 : i32
    %c0_i32_0 = arith.constant 0 : i32
    %c0_i32_1 = arith.constant 0 : i32
    return %c0_i32, %c0_i32_0 : i32, i32
  }
  func.func @transform_15(%arg0: i32) -> (i32, i32) {
    %c0_i32 = arith.constant 0 : i32
    %c0_i32_0 = arith.constant 0 : i32
    %c0_i32_1 = arith.constant 0 : i32
    return %c0_i32, %c0_i32_0 : i32, i32
  }
  func.func @transform_16(%arg0: i32) -> (i32, i32) {
    %c0_i32 = arith.constant 0 : i32
    %c0_i32_0 = arith.constant 0 : i32
    %c0_i32_1 = arith.constant 0 : i32
    return %c0_i32, %c0_i32_0 : i32, i32
  }
  func.func @transform_17(%arg0: i32) -> (i32, i32) {
    %c0_i32 = arith.constant 0 : i32
    %c0_i32_0 = arith.constant 0 : i32
    %c0_i32_1 = arith.constant 0 : i32
    return %c0_i32, %c0_i32_0 : i32, i32
  }
  func.func @transform_18(%arg0: i32) -> (i32, i32) {
    %c0_i32 = arith.constant 0 : i32
    %c0_i32_0 = arith.constant 0 : i32
    %c0_i32_1 = arith.constant 0 : i32
    return %c0_i32, %c0_i32_0 : i32, i32
  }
  func.func @transform_19(%arg0: i32) -> (i32, i32) {
    %c0_i32 = arith.constant 0 : i32
    %c0_i32_0 = arith.constant 0 : i32
    return %arg0, %c0_i32 : i32, i32
  }
  func.func @transform_20(%arg0: i32) -> (i32, i32) {
    %c0_i32 = arith.constant 0 : i32
    %c0_i32_0 = arith.constant 0 : i32
    return %arg0, %c0_i32 : i32, i32
  }
}

</mosaic_0001>

<bundles_post_ra>
// kernel: tpu_custom_call.1
= control target key start
LH: loop header
LB: loop body
LE: loop exit
PB: predicated region body
PF: predicated region fallthrough
CT: control target
= control target key end

     0   :  { %s2759_s0 = inlined_call_operand.hbm [shape: f32[16,128], index: 0, kind: input, shape index: {}]   ;;  %s2760_s1 = inlined_call_operand.hbm [shape: bf16[128,128], index: 1, kind: input, shape index: {}]   ;;  %s2761_s2 = inlined_call_operand.hbm [shape: f32[1,128], index: 2, kind: input, shape index: {}]   ;;  %s2762_s3 = inlined_call_operand.hbm [shape: bf16[128,128], index: 3, kind: input, shape index: {}]   ;;  %s2763_s4 = inlined_call_operand.hbm [shape: f32[1,128], index: 4, kind: input, shape index: {}]   ;;  %s2764_s5 = inlined_call_operand.hbm [shape: bf16[128,128], index: 5, kind: input, shape index: {}]   ;;  %s2765_s6 = inlined_call_operand.hbm [shape: f32[1,128], index: 6, kind: input, shape index: {}]   ;;  %s2766_s7 = inlined_call_operand.hbm [shape: bf16[128,128], index: 7, kind: input, shape index: {}]   ;;  %s2767_s8 = inlined_call_operand.hbm [shape: f32[1,128], index: 8, kind: input, shape index: {}]   ;;  %s2768_s9 = inlined_call_operand.hbm [shape: bf16[128,128], index: 9, kind: input, shape index: {}]   ;;  %s2769_s10 = inlined_call_operand.hbm [shape: f32[1,128], index: 10, kind: input, shape index: {}]   ;;  %s2770_s11 = inlined_call_operand.hbm [shape: bf16[128,128], index: 11, kind: input, shape index: {}]   ;;  %s2771_s12 = inlined_call_operand.hbm [shape: f32[1,128], index: 12, kind: input, shape index: {}]   ;;  %s2772_s13 = inlined_call_operand.hbm [shape: bf16[128,128], index: 13, kind: input, shape index: {}]   ;;  %s2773_s14 = inlined_call_operand.hbm [shape: f32[1,128], index: 14, kind: input, shape index: {}]   ;;  %s2774_s15 = inlined_call_operand.hbm [shape: bf16[128,128], index: 15, kind: input, shape index: {}]   ;;  %s2775_s16 = inlined_call_operand.hbm [shape: f32[1,128], index: 16, kind: input, shape index: {}]   ;;  %s2776_s17 = inlined_call_operand.vmem [shape: bf16[128,128], index: 17, kind: input, shape index: {}]   ;;  %s2777_s18 = inlined_call_operand.vmem [shape: f32[1,128], index: 18, kind: input, shape index: {}]   ;;  %s2778_s19 = inlined_call_operand.hbm [shape: f32[16,128], index: 19, kind: output, shape index: {0}]   ;;  %s2779_s20 = inlined_call_operand.hbm [shape: f32[16,128], index: 20, kind: output, shape index: {1}]  }
   0x1   :  { %2787 = sst [smem:[#allocation43_spill]] %s2759_s0 }
   0x2   :  { %2788 = sst [smem:[#allocation44_spill]] %s2760_s1 }
   0x3   :  { %2789 = sst [smem:[#allocation45_spill]] %s2761_s2 }
   0x4   :  { %2790 = sst [smem:[#allocation46_spill]] %s2762_s3 }
   0x5   :  { %2791 = sst [smem:[#allocation47_spill]] %s2763_s4 }
   0x6   :  { %2792 = sst [smem:[#allocation48_spill]] %s2777_s18 }
   0x7   :  { %2793 = sst [smem:[#allocation49_spill]] %s2778_s19 }
   0x8   :  { %2794 = sst [smem:[#allocation50_spill]] %s2779_s20 }
   0x9   :  { %26 = vsyncpa [#allocation3], 0 }
   0xa   :  { %27 = vsyncpa [#allocation6], 0 }
   0xb   :  { %28 = vsyncpa [#allocation9], 0 }
   0xc   :  { %29 = vsyncpa [#allocation12], 0 }
   0xd   :  { %30 = vsyncpa [#allocation15], 0 }
   0xe   :  { %31 = vsyncpa [#allocation18], 0 }
   0xf   :  { %32 = vsyncpa [#allocation21], 0 }
  0x10   :  { %33 = vsyncpa [#allocation24], 0 }
  0x11   :  { %34 = vsyncpa [#allocation27], 0 }
  0x12   :  { %35 = vsyncpa [#allocation4], 0 }
  0x13   :  { %36 = vsyncpa [#allocation31], 0  ;;  %s2247_s1 = smov [#allocation5]   ;;  %s2795_s2 = sld [smem:[#allocation44_spill]] }
  0x14   :  { %s54_s22 = sshll.u32 %s2247_s1, 4  ;;  %s55_s22 = int_to_ptr.vmem [resolvable:$true] %s54_s22 }
  0x19   :  { %s1807_s25 = scalar_lea.hbm %s2795_s2, 1024 }
  0x1a   :  { %p1808_p0 = scmp.ne.s32.totalorder %s2795_s2, %s1807_s25  ;;  %p1811_p1 = scmp.lt.u32.totalorder %s1807_s25, %s2795_s2 }
  0x1c   :  { %p1813_p2 = pnand %p1811_p1, %p1808_p0 }
  0x1e   :  { %1816 = shalt.err (!%p1813_p2)
}
  0x1f   :  { %s1817_s4 = scalar_lea.vmem %s55_s22, 1024  ;;  %p1822_p4 = scmp.lt.s32.totalorder %s55_s22, %s55_s22 }
  0x20   :  { %p1818_p3 = scmp.ne.s32.totalorder %s55_s22, %s1817_s4  ;;  %p1823_p5 = scmp.lt.s32.totalorder %s1817_s4, %s1817_s4 }
  0x22   :  { %p1824_p6 = por %p1823_p5, %p1822_p4 }
  0x24   :  { %p1825_p7 = pnand %p1824_p6, %p1818_p3 }
  0x26   :  { %1828 = shalt.err (!%p1825_p7)
}
  0x27   :  { %s2248_s29 = smov 64   ;;  %s2249_s30 = smov 4  }
  0x28   :  { %60 = dma.hbm_to_vmem [thread:$0]  %s2795_s2, 1024, %s55_s22, [#allocation6], %s2248_s29, %s2248_s29, %s2249_s30  }
  0x29   :  { %s2250_s1 = smov [#allocation8]   ;;  %s2251_s24 = smov [#allocation11]  }
  0x2a   :  { %s76_s23 = sshll.u32 %s2250_s1, 4  ;;  %s98_s25 = sshll.u32 %s2251_s24, 4  ;;  %s77_s23 = int_to_ptr.vmem [resolvable:$true] %s76_s23  ;;  %s99_s25 = int_to_ptr.vmem [resolvable:$true] %s98_s25 }
  0x2b   :  { %s2796_s27 = sld [smem:[#allocation46_spill]] }
  0x31   :  { %s1829_s28 = scalar_lea.hbm %s2796_s27, 1024 }
  0x32   :  { %p1830_p8 = scmp.ne.s32.totalorder %s2796_s27, %s1829_s28  ;;  %p1833_p9 = scmp.lt.u32.totalorder %s1829_s28, %s2796_s27 }
  0x34   :  { %p1835_p10 = pnand %p1833_p9, %p1830_p8 }
  0x36   :  { %1838 = shalt.err (!%p1835_p10)
}
  0x37   :  { %s1839_s22 = scalar_lea.vmem %s77_s23, 1024  ;;  %p1844_p12 = scmp.lt.s32.totalorder %s77_s23, %s77_s23 }
  0x38   :  { %p1840_p11 = scmp.ne.s32.totalorder %s77_s23, %s1839_s22  ;;  %p1845_p13 = scmp.lt.s32.totalorder %s1839_s22, %s1839_s22 }
  0x3a   :  { %p1846_p0 = por %p1845_p13, %p1844_p12 }
  0x3c   :  { %p1847_p1 = pnand %p1846_p0, %p1840_p11 }
  0x3e   :  { %1850 = shalt.err (!%p1847_p1)
}
  0x3f   :  { %82 = dma.hbm_to_vmem [thread:$0]  %s2796_s27, 1024, %s77_s23, [#allocation9], %s2248_s29, %s2248_s29, %s2249_s30  }
  0x40   :  { %s1851_s19 = scalar_lea.hbm %s2764_s5, 1024 }
  0x41   :  { %p1852_p2 = scmp.ne.s32.totalorder %s2764_s5, %s1851_s19  ;;  %p1855_p3 = scmp.lt.u32.totalorder %s1851_s19, %s2764_s5 }
  0x43   :  { %p1857_p4 = pnand %p1855_p3, %p1852_p2 }
  0x45   :  { %1860 = shalt.err (!%p1857_p4)
}
  0x46   :  { %s1861_s26 = scalar_lea.vmem %s99_s25, 1024  ;;  %p1866_p6 = scmp.lt.s32.totalorder %s99_s25, %s99_s25 }
  0x47   :  { %p1862_p5 = scmp.ne.s32.totalorder %s99_s25, %s1861_s26  ;;  %p1867_p7 = scmp.lt.s32.totalorder %s1861_s26, %s1861_s26 }
  0x49   :  { %p1868_p8 = por %p1867_p7, %p1866_p6 }
  0x4b   :  { %p1869_p9 = pnand %p1868_p8, %p1862_p5 }
  0x4d   :  { %1872 = shalt.err (!%p1869_p9)
}
  0x4e   :  { %104 = dma.hbm_to_vmem [thread:$0]  %s2764_s5, 1024, %s99_s25, [#allocation12], %s2248_s29, %s2248_s29, %s2249_s30  }
  0x4f   :  { %s2252_s28 = smov [#allocation14]   ;;  %s2253_s22 = smov [#allocation17]  }
  0x50   :  { %s120_s4 = sshll.u32 %s2252_s28, 4  ;;  %s142_s2 = sshll.u32 %s2253_s22, 4  ;;  %s121_s4 = int_to_ptr.vmem [resolvable:$true] %s120_s4  ;;  %s143_s2 = int_to_ptr.vmem [resolvable:$true] %s142_s2 }
  0x51   :  { %s1873_s18 = scalar_lea.hbm %s2766_s7, 1024 }
  0x52   :  { %p1874_p10 = scmp.ne.s32.totalorder %s2766_s7, %s1873_s18  ;;  %p1877_p11 = scmp.lt.u32.totalorder %s1873_s18, %s2766_s7 }
  0x54   :  { %p1879_p12 = pnand %p1877_p11, %p1874_p10 }
  0x56   :  { %1882 = shalt.err (!%p1879_p12)
}
  0x57   :  { %s1883_s5 = scalar_lea.vmem %s121_s4, 1024  ;;  %p1888_p0 = scmp.lt.s32.totalorder %s121_s4, %s121_s4 }
  0x58   :  { %p1884_p13 = scmp.ne.s32.totalorder %s121_s4, %s1883_s5  ;;  %p1889_p1 = scmp.lt.s32.totalorder %s1883_s5, %s1883_s5 }
  0x5a   :  { %p1890_p2 = por %p1889_p1, %p1888_p0 }
  0x5c   :  { %p1891_p3 = pnand %p1890_p2, %p1884_p13 }
  0x5e   :  { %1894 = shalt.err (!%p1891_p3)
}
  0x5f   :  { %126 = dma.hbm_to_vmem [thread:$0]  %s2766_s7, 1024, %s121_s4, [#allocation15], %s2248_s29, %s2248_s29, %s2249_s30  }
  0x60   :  { %s1895_s27 = scalar_lea.hbm %s2768_s9, 1024 }
  0x61   :  { %p1896_p4 = scmp.ne.s32.totalorder %s2768_s9, %s1895_s27  ;;  %p1899_p5 = scmp.lt.u32.totalorder %s1895_s27, %s2768_s9 }
  0x63   :  { %p1901_p6 = pnand %p1899_p5, %p1896_p4 }
  0x65   :  { %1904 = shalt.err (!%p1901_p6)
}
  0x66   :  { %s1905_s18 = scalar_lea.vmem %s143_s2, 1024  ;;  %p1910_p8 = scmp.lt.s32.totalorder %s143_s2, %s143_s2 }
  0x67   :  { %p1906_p7 = scmp.ne.s32.totalorder %s143_s2, %s1905_s18  ;;  %p1911_p9 = scmp.lt.s32.totalorder %s1905_s18, %s1905_s18 }
  0x69   :  { %p1912_p10 = por %p1911_p9, %p1910_p8 }
  0x6b   :  { %p1913_p11 = pnand %p1912_p10, %p1906_p7 }
  0x6d   :  { %1916 = shalt.err (!%p1913_p11)
}
  0x6e   :  { %148 = dma.hbm_to_vmem [thread:$0]  %s2768_s9, 1024, %s143_s2, [#allocation18], %s2248_s29, %s2248_s29, %s2249_s30  }
  0x6f   :  { %s2254_s19 = smov [#allocation20]   ;;  %s2255_s1 = smov [#allocation23]  }
  0x70   :  { %s164_s21 = sshll.u32 %s2254_s19, 4  ;;  %s186_s24 = sshll.u32 %s2255_s1, 4  ;;  %s165_s21 = int_to_ptr.vmem [resolvable:$true] %s164_s21  ;;  %s187_s24 = int_to_ptr.vmem [resolvable:$true] %s186_s24 }
  0x71   :  { %s1917_s3 = scalar_lea.hbm %s2770_s11, 1024 }
  0x72   :  { %p1918_p12 = scmp.ne.s32.totalorder %s2770_s11, %s1917_s3  ;;  %p1921_p13 = scmp.lt.u32.totalorder %s1917_s3, %s2770_s11 }
  0x74   :  { %p1923_p0 = pnand %p1921_p13, %p1918_p12 }
  0x76   :  { %1926 = shalt.err (!%p1923_p0)
}
  0x77   :  { %s1927_s9 = scalar_lea.vmem %s165_s21, 1024  ;;  %p1932_p2 = scmp.lt.s32.totalorder %s165_s21, %s165_s21 }
  0x78   :  { %p1928_p1 = scmp.ne.s32.totalorder %s165_s21, %s1927_s9  ;;  %p1933_p3 = scmp.lt.s32.totalorder %s1927_s9, %s1927_s9 }
  0x7a   :  { %p1934_p4 = por %p1933_p3, %p1932_p2 }
  0x7c   :  { %p1935_p5 = pnand %p1934_p4, %p1928_p1 }
  0x7e   :  { %1938 = shalt.err (!%p1935_p5)
}
  0x7f   :  { %170 = dma.hbm_to_vmem [thread:$0]  %s2770_s11, 1024, %s165_s21, [#allocation21], %s2248_s29, %s2248_s29, %s2249_s30  }
  0x80   :  { %s1939_s18 = scalar_lea.hbm %s2772_s13, 1024 }
  0x81   :  { %p1940_p6 = scmp.ne.s32.totalorder %s2772_s13, %s1939_s18  ;;  %p1943_p7 = scmp.lt.u32.totalorder %s1939_s18, %s2772_s13 }
  0x83   :  { %p1945_p8 = pnand %p1943_p7, %p1940_p6 }
  0x85   :  { %1948 = shalt.err (!%p1945_p8)
}
  0x86   :  { %s1949_s5 = scalar_lea.vmem %s187_s24, 1024  ;;  %p1954_p10 = scmp.lt.s32.totalorder %s187_s24, %s187_s24 }
  0x87   :  { %p1950_p9 = scmp.ne.s32.totalorder %s187_s24, %s1949_s5  ;;  %p1955_p11 = scmp.lt.s32.totalorder %s1949_s5, %s1949_s5 }
  0x89   :  { %p1956_p12 = por %p1955_p11, %p1954_p10 }
  0x8b   :  { %p1957_p13 = pnand %p1956_p12, %p1950_p9 }
  0x8d   :  { %1960 = shalt.err (!%p1957_p13)
}
  0x8e   :  { %192 = dma.hbm_to_vmem [thread:$0]  %s2772_s13, 1024, %s187_s24, [#allocation24], %s2248_s29, %s2248_s29, %s2249_s30  }
  0x8f   :  { %s2256_s25 = smov [#allocation26]   ;;  %s2257_s26 = smov [#allocation2]  }
  0x90   :  { %s208_s3 = sshll.u32 %s2256_s25, 4  ;;  %s42_s23 = sshll.u32 %s2257_s26, 4  ;;  %s209_s3 = int_to_ptr.vmem [resolvable:$true] %s208_s3  ;;  %s43_s23 = int_to_ptr.vmem [resolvable:$true] %s42_s23 }
  0x91   :  { %s1961_s9 = scalar_lea.hbm %s2774_s15, 1024 }
  0x92   :  { %p1962_p0 = scmp.ne.s32.totalorder %s2774_s15, %s1961_s9  ;;  %p1965_p1 = scmp.lt.u32.totalorder %s1961_s9, %s2774_s15 }
  0x94   :  { %p1967_p2 = pnand %p1965_p1, %p1962_p0 }
  0x96   :  { %1970 = shalt.err (!%p1967_p2)
}
  0x97   :  { %s1971_s13 = scalar_lea.vmem %s209_s3, 1024  ;;  %p1976_p4 = scmp.lt.s32.totalorder %s209_s3, %s209_s3 }
  0x98   :  { %p1972_p3 = scmp.ne.s32.totalorder %s209_s3, %s1971_s13  ;;  %p1977_p5 = scmp.lt.s32.totalorder %s1971_s13, %s1971_s13 }
  0x9a   :  { %p1978_p6 = por %p1977_p5, %p1976_p4 }
  0x9c   :  { %p1979_p7 = pnand %p1978_p6, %p1972_p3 }
  0x9e   :  { %1982 = shalt.err (!%p1979_p7)
}
  0x9f   :  { %214 = dma.hbm_to_vmem [thread:$0]  %s2774_s15, 1024, %s209_s3, [#allocation27], %s2248_s29, %s2248_s29, %s2249_s30  }
  0xa0   :  { %s2797_s19 = sld [smem:[#allocation43_spill]] }
  0xa6   :  { %s1983_s1 = scalar_lea.hbm %s2797_s19, 256 }
  0xa7   :  { %p1984_p8 = scmp.ne.s32.totalorder %s2797_s19, %s1983_s1  ;;  %p1987_p9 = scmp.lt.u32.totalorder %s1983_s1, %s2797_s19 }
  0xa9   :  { %p1989_p10 = pnand %p1987_p9, %p1984_p8 }
  0xab   :  { %1992 = shalt.err (!%p1989_p10)
}
  0xac   :  { %s1993_s26 = scalar_lea.vmem %s43_s23, 256  ;;  %p1998_p12 = scmp.lt.s32.totalorder %s43_s23, %s43_s23 }
  0xad   :  { %p1994_p11 = scmp.ne.s32.totalorder %s43_s23, %s1993_s26  ;;  %p1999_p13 = scmp.lt.s32.totalorder %s1993_s26, %s1993_s26 }
  0xaf   :  { %p2000_p0 = por %p1999_p13, %p1998_p12 }
  0xb1   :  { %p2001_p1 = pnand %p2000_p0, %p1994_p11 }
  0xb3   :  { %2004 = shalt.err (!%p2001_p1)
}
  0xb4   :  { %s2258_s15 = smov 128   ;;  %s2259_s29 = smov 8  }
  0xb5   :  { %48 = dma.hbm_to_vmem [thread:$0]  %s2797_s19, 256, %s43_s23, [#allocation3], %s2258_s15, %s2258_s15, %s2259_s29  }
  0xb6   :  { %s2260_s27 = smov [#allocation7]   ;;  %s2261_s9 = smov [#allocation10]  }
  0xb7   :  { %s67_s28 = sshll.u32 %s2260_s27, 4  ;;  %s89_s2 = sshll.u32 %s2261_s9, 4  ;;  %s68_s28 = int_to_ptr.vmem [resolvable:$true] %s67_s28  ;;  %s90_s2 = int_to_ptr.vmem [resolvable:$true] %s89_s2 }
  0xb8   :  { %s2798_s20 = sld [smem:[#allocation45_spill]] }
  0xbe   :  { %s2005_s13 = scalar_lea.hbm %s2798_s20, 16 }
  0xbf   :  { %p2006_p2 = scmp.ne.s32.totalorder %s2798_s20, %s2005_s13  ;;  %p2009_p3 = scmp.lt.u32.totalorder %s2005_s13, %s2798_s20 }
  0xc1   :  { %p2011_p4 = pnand %p2009_p3, %p2006_p2 }
  0xc3   :  { %2014 = shalt.err (!%p2011_p4)
}
  0xc4   :  { %s2015_s23 = scalar_lea.vmem %s68_s28, 16  ;;  %s2019_s19 = scalar_lea.vmem %s68_s28, 32 }
  0xc5   :  { %p2016_p5 = scmp.ne.s32.totalorder %s68_s28, %s2015_s23  ;;  %p2020_p6 = scmp.lt.s32.totalorder %s68_s28, %s68_s28 }
  0xc6   :  { %p2021_p7 = scmp.lt.s32.totalorder %s2019_s19, %s2015_s23 }
  0xc8   :  { %p2022_p8 = por %p2021_p7, %p2020_p6 }
  0xca   :  { %p2023_p9 = pnand %p2022_p8, %p2016_p5 }
  0xcc   :  { %2026 = shalt.err (!%p2023_p9)
}
  0xcd   :  { %70 = dma.hbm_to_vmem [thread:$0]  %s2798_s20, 16, %s68_s28, [#allocation6]  }
  0xce   :  { %s2799_s25 = sld [smem:[#allocation47_spill]] }
  0xd4   :  { %s2027_s26 = scalar_lea.hbm %s2799_s25, 16 }
  0xd5   :  { %p2028_p10 = scmp.ne.s32.totalorder %s2799_s25, %s2027_s26  ;;  %p2031_p11 = scmp.lt.u32.totalorder %s2027_s26, %s2799_s25 }
  0xd7   :  { %p2033_p12 = pnand %p2031_p11, %p2028_p10 }
  0xd9   :  { %2036 = shalt.err (!%p2033_p12)
}
  0xda   :  { %s2037_s22 = scalar_lea.vmem %s90_s2, 16  ;;  %s2041_s0 = scalar_lea.vmem %s90_s2, 32 }
  0xdb   :  { %p2038_p13 = scmp.ne.s32.totalorder %s90_s2, %s2037_s22  ;;  %p2042_p0 = scmp.lt.s32.totalorder %s90_s2, %s90_s2 }
  0xdc   :  { %p2043_p1 = scmp.lt.s32.totalorder %s2041_s0, %s2037_s22 }
  0xde   :  { %p2044_p2 = por %p2043_p1, %p2042_p0 }
  0xe0   :  { %p2045_p3 = pnand %p2044_p2, %p2038_p13 }
  0xe2   :  { %2048 = shalt.err (!%p2045_p3)
}
  0xe3   :  { %92 = dma.hbm_to_vmem [thread:$0]  %s2799_s25, 16, %s90_s2, [#allocation9]  }
  0xe4   :  { %s2262_s13 = smov [#allocation13]   ;;  %s2263_s18 = smov [#allocation16]  }
  0xe5   :  { %s111_s24 = sshll.u32 %s2262_s13, 4  ;;  %s133_s7 = sshll.u32 %s2263_s18, 4  ;;  %s112_s24 = int_to_ptr.vmem [resolvable:$true] %s111_s24  ;;  %s134_s7 = int_to_ptr.vmem [resolvable:$true] %s133_s7 }
  0xe6   :  { %s2049_s19 = scalar_lea.hbm %s2765_s6, 16 }
  0xe7   :  { %p2050_p4 = scmp.ne.s32.totalorder %s2765_s6, %s2049_s19  ;;  %p2053_p5 = scmp.lt.u32.totalorder %s2049_s19, %s2765_s6 }
  0xe9   :  { %p2055_p6 = pnand %p2053_p5, %p2050_p4 }
  0xeb   :  { %2058 = shalt.err (!%p2055_p6)
}
  0xec   :  { %s2059_s2 = scalar_lea.vmem %s112_s24, 16  ;;  %s2063_s25 = scalar_lea.vmem %s112_s24, 32 }
  0xed   :  { %p2060_p7 = scmp.ne.s32.totalorder %s112_s24, %s2059_s2  ;;  %p2064_p8 = scmp.lt.s32.totalorder %s112_s24, %s112_s24 }
  0xee   :  { %p2065_p9 = scmp.lt.s32.totalorder %s2063_s25, %s2059_s2 }
  0xf0   :  { %p2066_p10 = por %p2065_p9, %p2064_p8 }
  0xf2   :  { %p2067_p11 = pnand %p2066_p10, %p2060_p7 }
  0xf4   :  { %2070 = shalt.err (!%p2067_p11)
}
  0xf5   :  { %114 = dma.hbm_to_vmem [thread:$0]  %s2765_s6, 16, %s112_s24, [#allocation12]  }
  0xf6   :  { %s2071_s9 = scalar_lea.hbm %s2767_s8, 16 }
  0xf7   :  { %p2072_p12 = scmp.ne.s32.totalorder %s2767_s8, %s2071_s9  ;;  %p2075_p13 = scmp.lt.u32.totalorder %s2071_s9, %s2767_s8 }
  0xf9   :  { %p2077_p0 = pnand %p2075_p13, %p2072_p12 }
  0xfb   :  { %2080 = shalt.err (!%p2077_p0)
}
  0xfc   :  { %s2081_s13 = scalar_lea.vmem %s134_s7, 16  ;;  %s2085_s18 = scalar_lea.vmem %s134_s7, 32 }
  0xfd   :  { %p2082_p1 = scmp.ne.s32.totalorder %s134_s7, %s2081_s13  ;;  %p2086_p2 = scmp.lt.s32.totalorder %s134_s7, %s134_s7 }
  0xfe   :  { %p2087_p3 = scmp.lt.s32.totalorder %s2085_s18, %s2081_s13 }
 0x100   :  { %p2088_p4 = por %p2087_p3, %p2086_p2 }
 0x102   :  { %p2089_p5 = pnand %p2088_p4, %p2082_p1 }
 0x104   :  { %2092 = shalt.err (!%p2089_p5)
}
 0x105   :  { %136 = dma.hbm_to_vmem [thread:$0]  %s2767_s8, 16, %s134_s7, [#allocation15]  }
 0x106   :  { %s2264_s4 = smov [#allocation19]   ;;  %s2265_s19 = smov [#allocation22]  }
 0x107   :  { %s155_s23 = sshll.u32 %s2264_s4, 4  ;;  %s177_s1 = sshll.u32 %s2265_s19, 4  ;;  %s156_s23 = int_to_ptr.vmem [resolvable:$true] %s155_s23  ;;  %s178_s1 = int_to_ptr.vmem [resolvable:$true] %s177_s1 }
 0x108   :  { %s2093_s21 = scalar_lea.hbm %s2769_s10, 16 }
 0x109   :  { %p2094_p6 = scmp.ne.s32.totalorder %s2769_s10, %s2093_s21  ;;  %p2097_p7 = scmp.lt.u32.totalorder %s2093_s21, %s2769_s10 }
 0x10b   :  { %p2099_p8 = pnand %p2097_p7, %p2094_p6 }
 0x10d   :  { %2102 = shalt.err (!%p2099_p8)
}
 0x10e   :  { %s2103_s8 = scalar_lea.vmem %s156_s23, 16  ;;  %s2107_s7 = scalar_lea.vmem %s156_s23, 32 }
 0x10f   :  { %p2104_p9 = scmp.ne.s32.totalorder %s156_s23, %s2103_s8  ;;  %p2108_p10 = scmp.lt.s32.totalorder %s156_s23, %s156_s23 }
 0x110   :  { %p2109_p11 = scmp.lt.s32.totalorder %s2107_s7, %s2103_s8 }
 0x112   :  { %p2110_p12 = por %p2109_p11, %p2108_p10 }
 0x114   :  { %p2111_p13 = pnand %p2110_p12, %p2104_p9 }
 0x116   :  { %2114 = shalt.err (!%p2111_p13)
}
 0x117   :  { %158 = dma.hbm_to_vmem [thread:$0]  %s2769_s10, 16, %s156_s23, [#allocation18]  }
 0x118   :  { %s2115_s0 = scalar_lea.hbm %s2771_s12, 16 }
 0x119   :  { %p2116_p0 = scmp.ne.s32.totalorder %s2771_s12, %s2115_s0  ;;  %p2119_p1 = scmp.lt.u32.totalorder %s2115_s0, %s2771_s12 }
 0x11b   :  { %p2121_p2 = pnand %p2119_p1, %p2116_p0 }
 0x11d   :  { %2124 = shalt.err (!%p2121_p2)
}
 0x11e   :  { %s2125_s6 = scalar_lea.vmem %s178_s1, 16  ;;  %s2129_s24 = scalar_lea.vmem %s178_s1, 32 }
 0x11f   :  { %p2126_p3 = scmp.ne.s32.totalorder %s178_s1, %s2125_s6  ;;  %p2130_p4 = scmp.lt.s32.totalorder %s178_s1, %s178_s1 }
 0x120   :  { %p2131_p5 = scmp.lt.s32.totalorder %s2129_s24, %s2125_s6 }
 0x122   :  { %p2132_p6 = por %p2131_p5, %p2130_p4 }
 0x124   :  { %p2133_p7 = pnand %p2132_p6, %p2126_p3 }
 0x126   :  { %2136 = shalt.err (!%p2133_p7)
}
 0x127   :  { %180 = dma.hbm_to_vmem [thread:$0]  %s2771_s12, 16, %s178_s1, [#allocation21]  }
 0x128   :  { %s2266_s23 = smov [#allocation25]   ;;  %s2267_s5 = smov [#allocation28]  }
 0x129   :  { %s199_s19 = sshll.u32 %s2266_s23, 4  ;;  %s221_s11 = sshll.u32 %s2267_s5, 4  ;;  %s200_s19 = int_to_ptr.vmem [resolvable:$true] %s199_s19  ;;  %s222_s11 = int_to_ptr.vmem [resolvable:$true] %s221_s11 }
 0x12a   :  { %s2137_s25 = scalar_lea.hbm %s2773_s14, 16 }
 0x12b   :  { %p2138_p8 = scmp.ne.s32.totalorder %s2773_s14, %s2137_s25  ;;  %p2141_p9 = scmp.lt.u32.totalorder %s2137_s25, %s2773_s14 }
 0x12d   :  { %p2143_p10 = pnand %p2141_p9, %p2138_p8 }
 0x12f   :  { %2146 = shalt.err (!%p2143_p10)
}
 0x130   :  { %s2147_s12 = scalar_lea.vmem %s200_s19, 16  ;;  %s2151_s1 = scalar_lea.vmem %s200_s19, 32 }
 0x131   :  { %p2148_p11 = scmp.ne.s32.totalorder %s200_s19, %s2147_s12  ;;  %p2152_p12 = scmp.lt.s32.totalorder %s200_s19, %s200_s19 }
 0x132   :  { %p2153_p13 = scmp.lt.s32.totalorder %s2151_s1, %s2147_s12 }
 0x134   :  { %p2154_p0 = por %p2153_p13, %p2152_p12 }
 0x136   :  { %p2155_p1 = pnand %p2154_p0, %p2148_p11 }
 0x138   :  { %2158 = shalt.err (!%p2155_p1)
}
 0x139   :  { %202 = dma.hbm_to_vmem [thread:$0]  %s2773_s14, 16, %s200_s19, [#allocation24]  }
 0x13a   :  { %s2159_s0 = scalar_lea.hbm %s2775_s16, 16 }
 0x13b   :  { %p2160_p2 = scmp.ne.s32.totalorder %s2775_s16, %s2159_s0  ;;  %p2163_p3 = scmp.lt.u32.totalorder %s2159_s0, %s2775_s16 }
 0x13d   :  { %p2165_p4 = pnand %p2163_p3, %p2160_p2 }
 0x13f   :  { %2168 = shalt.err (!%p2165_p4)
}
 0x140   :  { %s2169_s6 = scalar_lea.vmem %s222_s11, 16  ;;  %s2173_s24 = scalar_lea.vmem %s222_s11, 32 }
 0x141   :  { %p2170_p5 = scmp.ne.s32.totalorder %s222_s11, %s2169_s6  ;;  %p2174_p6 = scmp.lt.s32.totalorder %s222_s11, %s222_s11 }
 0x142   :  { %p2175_p7 = scmp.lt.s32.totalorder %s2173_s24, %s2169_s6 }
 0x144   :  { %p2176_p8 = por %p2175_p7, %p2174_p6 }
 0x146   :  { %p2177_p9 = pnand %p2176_p8, %p2170_p5 }
 0x148   :  { %2180 = shalt.err (!%p2177_p9)
}
 0x149   :  { %224 = dma.hbm_to_vmem [thread:$0]  %s2775_s16, 16, %s222_s11, [#allocation27]  }
 0x14a   :  { %2225 = dma.done.wait [#allocation3], 256  }
 0x14b   :  { %2226 = vsyncadd [#allocation3], 4294967040 }
 0x14c   :  { %2227 = dma.done.wait [#allocation6], 1040  }
 0x14d   :  { %2228 = vsyncadd [#allocation6], 4294966256 }
 0x14e   :  { %2229 = dma.done.wait [#allocation9], 1040  }
 0x14f   :  { %2230 = vsyncadd [#allocation9], 4294966256 }
 0x150   :  { %2231 = dma.done.wait [#allocation12], 1040  }
 0x151   :  { %2232 = vsyncadd [#allocation12], 4294966256 }
 0x152   :  { %2233 = dma.done.wait [#allocation15], 1040  }
 0x153   :  { %2234 = vsyncadd [#allocation15], 4294966256 }
 0x154   :  { %2235 = dma.done.wait [#allocation18], 1040  }
 0x155   :  { %2236 = vsyncadd [#allocation18], 4294966256 }
 0x156   :  { %2237 = dma.done.wait [#allocation21], 1040  }
 0x157   :  { %2238 = vsyncadd [#allocation21], 4294966256 }
 0x158   :  { %2239 = dma.done.wait [#allocation24], 1040  }
 0x159   :  { %2240 = vsyncadd [#allocation24], 4294966256 }
 0x15a   :  { %2241 = dma.done.wait [#allocation27], 1040  }
 0x15b   :  { %2242 = vsyncadd [#allocation27], 4294966256  ;;  %v2268_v0 = vmov 0.0   ;;  %vm2269_vm0 = vmmov 0   ;;  %v1735_v1 = vld [vmem:[#allocation5] sm:$0xff]   ;;  %v1736_v2 = vld [vmem:[#allocation5 + $0x8] sm:$0xff]  }
 0x15c   :  { %1530 = vmatprep.subr.bf16.mxu0 %v2268_v0  ;;  %1546 = vmatprep.mubr.msk.bf16.mxu0 %vm2269_vm0, %v2268_v0  ;;  %v1737_v3 = vld [vmem:[#allocation5 + $0x10] sm:$0xff]   ;;  %v1743_v4 = vld [vmem:[#allocation8] sm:$0xff]   ;;  %v1738_v5 = vld [vmem:[#allocation5 + $0x18] sm:$0xff]  }
 0x15d   :  { %1550 = vmatprep.subr.bf16.mxu1 %v2268_v0  ;;  %1566 = vmatprep.mubr.msk.bf16.mxu1 %vm2269_vm0, %v2268_v0  ;;  %v1744_v6 = vld [vmem:[#allocation8 + $0x8] sm:$0xff]   ;;  %v1739_v7 = vld [vmem:[#allocation5 + $0x20] sm:$0xff]   ;;  %v1745_v8 = vld [vmem:[#allocation8 + $0x10] sm:$0xff]  }
 0x15e   :  { %1531 = vmatpush3.bf16.msra.mxu0 %v1735_v1  ;;  %1551 = vmatpush3.bf16.msra.mxu1 %v1743_v4  ;;  %v1740_v9 = vld [vmem:[#allocation5 + $0x28] sm:$0xff]   ;;  %v1746_v10 = vld [vmem:[#allocation8 + $0x18] sm:$0xff]   ;;  %v1741_v11 = vld [vmem:[#allocation5 + $0x30] sm:$0xff]  }
 0x15f   :  { %1532 = vmatprep.subr.bf16.mxu0 %v2268_v0  ;;  %1552 = vmatprep.subr.bf16.mxu1 %v2268_v0  ;;  %v1747_v12 = vld [vmem:[#allocation8 + $0x20] sm:$0xff]   ;;  %v1742_v13 = vld [vmem:[#allocation5 + $0x38] sm:$0xff]   ;;  %v281_v14 = vld [vmem:[#allocation2] sm:$0xff] }
 0x160   :  { %v282_v15 = vld [vmem:[#allocation2 + $0x8] sm:$0xff]  ;;  %v1748_v17 = vld [vmem:[#allocation8 + $0x28] sm:$0xff]   ;;  %v1368_v25 = vld [vmem:[#allocation7] ss:$0 sm:$0xff] }
 0x161   :  { %v283_v16 = vpack.c.bf16 %v282_v15, %v281_v14  ;;  %v1749_v18 = vld [vmem:[#allocation8 + $0x30] sm:$0xff]   ;;  %v1750_v19 = vld [vmem:[#allocation8 + $0x38] sm:$0xff]   ;;  %v1751_v20 = vld [vmem:[#allocation11] sm:$0xff]  }
 0x162   :  { %1533 = vmatpush3.bf16.msra.mxu0 %v1736_v2  ;;  %1553 = vmatpush3.bf16.msra.mxu1 %v1744_v6  ;;  %v1752_v21 = vld [vmem:[#allocation11 + $0x8] sm:$0xff]   ;;  %v1753_v22 = vld [vmem:[#allocation11 + $0x10] sm:$0xff]   ;;  %v1754_v23 = vld [vmem:[#allocation11 + $0x18] sm:$0xff]  }
 0x163   :  { %1534 = vmatprep.subr.bf16.mxu0 %v2268_v0  ;;  %1554 = vmatprep.subr.bf16.mxu1 %v2268_v0  ;;  %v1755_v24 = vld [vmem:[#allocation11 + $0x20] sm:$0xff]   ;;  %v1756_v37 = vld [vmem:[#allocation11 + $0x28] sm:$0xff]   ;;  %v1757_v38 = vld [vmem:[#allocation11 + $0x30] sm:$0xff]  }
 0x164   :  { %v1758_v39 = vld [vmem:[#allocation11 + $0x38] sm:$0xff]   ;;  %v1759_v40 = vld [vmem:[#allocation14] sm:$0xff]   ;;  %v1760_v41 = vld [vmem:[#allocation14 + $0x8] sm:$0xff]  }
 0x165   :  { %v1761_v42 = vld [vmem:[#allocation14 + $0x10] sm:$0xff]   ;;  %v1762_v43 = vld [vmem:[#allocation14 + $0x18] sm:$0xff]   ;;  %v1763_v44 = vld [vmem:[#allocation14 + $0x20] sm:$0xff]  }
 0x166   :  { %1535 = vmatpush3.bf16.msra.mxu0 %v1737_v3  ;;  %1555 = vmatpush3.bf16.msra.mxu1 %v1745_v8  ;;  %v1764_v45 = vld [vmem:[#allocation14 + $0x28] sm:$0xff]   ;;  %v1377_v46 = vld [vmem:[#allocation10] ss:$0 sm:$0xff]  ;;  %v1765_v58 = vld [vmem:[#allocation14 + $0x30] sm:$0xff]  }
 0x167   :  { %1536 = vmatprep.subr.bf16.mxu0 %v2268_v0  ;;  %1556 = vmatprep.subr.bf16.mxu1 %v2268_v0  ;;  %v1766_v59 = vld [vmem:[#allocation14 + $0x38] sm:$0xff]   ;;  %v1767_v60 = vld [vmem:[#allocation17] sm:$0xff]   ;;  %v1768_v61 = vld [vmem:[#allocation17 + $0x8] sm:$0xff]  }
 0x168   :  { %v1769_v62 = vld [vmem:[#allocation17 + $0x10] sm:$0xff]   ;;  %v1770_v63 = vld [vmem:[#allocation17 + $0x18] sm:$0xff]   ;;  %v1771_v1 = vld [vmem:[#allocation17 + $0x20] sm:$0xff]  }
 0x169   :  { %v1772_v2 = vld [vmem:[#allocation17 + $0x28] sm:$0xff]   ;;  %v1386_v3 = vld [vmem:[#allocation13] ss:$0 sm:$0xff]  ;;  %v1785_v15 = vld [vmem:[#allocation20 + $0x10] sm:$0xff]  }
 0x16a   :  { %1537 = vmatpush3.bf16.msra.mxu0 %v1738_v5  ;;  %1557 = vmatpush3.bf16.msra.mxu1 %v1746_v10  ;;  %v1784_v14 = vld [vmem:[#allocation20 + $0x8] sm:$0xff]  }
 0x16b   :  { %1538 = vmatprep.subr.bf16.mxu0 %v2268_v0  ;;  %1558 = vmatprep.subr.bf16.mxu1 %v2268_v0 }
 0x16e   :  { %1539 = vmatpush3.bf16.msra.mxu0 %v1739_v7  ;;  %1559 = vmatpush3.bf16.msra.mxu1 %v1747_v12  ;;  %v1774_v12 = vld [vmem:[#allocation17 + $0x38] sm:$0xff]  }
 0x16f   :  { %1540 = vmatprep.subr.bf16.mxu0 %v2268_v0  ;;  %1560 = vmatprep.subr.bf16.mxu1 %v2268_v0 }
 0x172   :  { %1541 = vmatpush3.bf16.msra.mxu0 %v1740_v9  ;;  %1561 = vmatpush3.bf16.msra.mxu1 %v1748_v17  ;;  %v1787_v17 = vld [vmem:[#allocation20 + $0x20] sm:$0xff]  }
 0x173   :  { %1542 = vmatprep.subr.bf16.mxu0 %v2268_v0  ;;  %1562 = vmatprep.subr.bf16.mxu1 %v2268_v0 }
 0x176   :  { %1543 = vmatpush3.bf16.msra.mxu0 %v1741_v11  ;;  %1563 = vmatpush3.bf16.msra.mxu1 %v1749_v18  ;;  %v1773_v11 = vld [vmem:[#allocation17 + $0x30] sm:$0xff]  }
 0x177   :  { %1544 = vmatprep.subr.bf16.mxu0 %v2268_v0  ;;  %1564 = vmatprep.subr.bf16.mxu1 %v2268_v0  ;;  %v1788_v18 = vld [vmem:[#allocation20 + $0x28] sm:$0xff]  }
 0x17a   :  { %1545 = vmatpush3.bf16.msra.mxu0 %v1742_v13  ;;  %1565 = vmatpush3.bf16.msra.mxu1 %v1750_v19  ;;  %v1783_v13 = vld [vmem:[#allocation20] sm:$0xff]   ;;  %v1395_v19 = vld [vmem:[#allocation16] ss:$0 sm:$0xff] }
 0x17b   :  { %1570 = vmatprep.subr.bf16.mxu0 %v2268_v0  ;;  %1590 = vmatprep.subr.bf16.mxu1 %v2268_v0 }
 0x17d   :  { %1547 = vmatmul.mubr.bf16.vlgmr.msra.gmra.mrb[0].mxu0 %v283_v16  ;;  %v1786_v16 = vld [vmem:[#allocation20 + $0x18] sm:$0xff]  }
 0x17e   :  { %1586 = vmatprep.mubr.msk.bf16.mxu0 %vm2269_vm0, %v2268_v0  ;;  %1571 = vmatpush3.bf16.msra.mxu0 %v1751_v20 }
 0x17f   :  { %1572 = vmatprep.subr.bf16.mxu0 %v2268_v0 }
 0x182   :  { %1573 = vmatpush3.bf16.msra.mxu0 %v1752_v21 }
 0x183   :  { %1574 = vmatprep.subr.bf16.mxu0 %v2268_v0 }
 0x186   :  { %1575 = vmatpush3.bf16.msra.mxu0 %v1753_v22 }
 0x187   :  { %1576 = vmatprep.subr.bf16.mxu0 %v2268_v0 }
 0x18a   :  { %1577 = vmatpush3.bf16.msra.mxu0 %v1754_v23 }
 0x18b   :  { %1578 = vmatprep.subr.bf16.mxu0 %v2268_v0 }
 0x18e   :  { %1579 = vmatpush3.bf16.msra.mxu0 %v1755_v24 }
 0x18f   :  { %1580 = vmatprep.subr.bf16.mxu0 %v2268_v0 }
 0x192   :  { %1581 = vmatpush3.bf16.msra.mxu0 %v1756_v37  ;;  %v1781_v37 = vld [vmem:[#allocation23 + $0x30] sm:$0xff]  }
 0x193   :  { %1582 = vmatprep.subr.bf16.mxu0 %v2268_v0 }
 0x196   :  { %1583 = vmatpush3.bf16.msra.mxu0 %v1757_v38  ;;  %v1782_v38 = vld [vmem:[#allocation23 + $0x38] sm:$0xff]  }
 0x197   :  { %1584 = vmatprep.subr.bf16.mxu0 %v2268_v0 }
 0x19a   :  { %1585 = vmatpush3.bf16.msra.mxu0 %v1758_v39  ;;  %v1789_v39 = vld [vmem:[#allocation20 + $0x30] sm:$0xff]  }
 0x19b   :  { %1610 = vmatprep.subr.bf16.mxu0 %v2268_v0 }
 0x250   :  { %v389_v26 = vpop.f32.mrb[0].mxu0 }
 0x251   :  { %v390_v27 = vadd.f32 %v1368_v25, %v389_v26  ;;  %v1548_v28 = vpop.f32.mrb[1].mxu0 }
 0x252   :  { %v392_v29 = vpop.f32.mrb[2].mxu0 }
 0x253   :  { %v396_v30 = vmul.f32 0.2, %v390_v27  ;;  %v393_v31 = vadd.f32 %v1368_v25, %v392_v29  ;;  %v1549_v32 = vpop.f32.mrb[3].mxu0 }
 0x254   :  { %v1776_v32 = vld [vmem:[#allocation23 + $0x8] sm:$0xff]  }
 0x255   :  { %v397_v33 = vmul.f32 0.2, %v393_v31  ;;  %v398_v34 = vmax.f32 %v390_v27, %v396_v30  ;;  %v1775_v30 = vld [vmem:[#allocation23] sm:$0xff]  }
 0x257   :  { %v399_v35 = vmax.f32 %v393_v31, %v397_v33  ;;  %v1777_v33 = vld [vmem:[#allocation23 + $0x10] sm:$0xff]  }
 0x259   :  { %v400_v36 = vpack.c.bf16 %v399_v35, %v398_v34  ;;  %v1778_v34 = vld [vmem:[#allocation23 + $0x18] sm:$0xff]   ;;  %v1779_v35 = vld [vmem:[#allocation23 + $0x20] sm:$0xff]  }
 0x25b   :  { %1567 = vmatmul.mubr.bf16.vlgmr.msra.gmra.mrb[0].mxu1 %v400_v36  ;;  %v1780_v36 = vld [vmem:[#allocation23 + $0x28] sm:$0xff]  }
 0x25c   :  { %1606 = vmatprep.mubr.msk.bf16.mxu1 %vm2269_vm0, %v2268_v0  ;;  %1591 = vmatpush3.bf16.msra.mxu1 %v1759_v40  ;;  %v1790_v40 = vld [vmem:[#allocation20 + $0x38] sm:$0xff]  }
 0x25d   :  { %1592 = vmatprep.subr.bf16.mxu1 %v2268_v0 }
 0x260   :  { %1593 = vmatpush3.bf16.msra.mxu1 %v1760_v41  ;;  %v1404_v41 = vld [vmem:[#allocation19] ss:$0 sm:$0xff] }
 0x261   :  { %1594 = vmatprep.subr.bf16.mxu1 %v2268_v0 }
 0x264   :  { %1595 = vmatpush3.bf16.msra.mxu1 %v1761_v42 }
 0x265   :  { %1596 = vmatprep.subr.bf16.mxu1 %v2268_v0 }
 0x268   :  { %1597 = vmatpush3.bf16.msra.mxu1 %v1762_v43 }
 0x269   :  { %1598 = vmatprep.subr.bf16.mxu1 %v2268_v0 }
 0x26c   :  { %1599 = vmatpush3.bf16.msra.mxu1 %v1763_v44 }
 0x26d   :  { %1600 = vmatprep.subr.bf16.mxu1 %v2268_v0 }
 0x270   :  { %1601 = vmatpush3.bf16.msra.mxu1 %v1764_v45 }
 0x271   :  { %1602 = vmatprep.subr.bf16.mxu1 %v2268_v0 }
 0x274   :  { %1603 = vmatpush3.bf16.msra.mxu1 %v1765_v58  ;;  %v1796_v58 = vld [vmem:[#allocation26 + $0x28] sm:$0xff]  }
 0x275   :  { %1604 = vmatprep.subr.bf16.mxu1 %v2268_v0 }
 0x278   :  { %1605 = vmatpush3.bf16.msra.mxu1 %v1766_v59  ;;  %v1422_v59 = vld [vmem:[#allocation25] ss:$0 sm:$0xff] }
 0x279   :  { %1630 = vmatprep.subr.bf16.mxu1 %v2268_v0 }
 0x32e   :  { %v506_v47 = vpop.f32.mrb[0].mxu1 }
 0x32f   :  { %v507_v48 = vadd.f32 %v1377_v46, %v506_v47  ;;  %v1568_v49 = vpop.f32.mrb[1].mxu1 }
 0x330   :  { %v509_v50 = vpop.f32.mrb[2].mxu1 }
 0x331   :  { %v513_v51 = vmul.f32 0.2, %v507_v48  ;;  %v510_v52 = vadd.f32 %v1377_v46, %v509_v50  ;;  %v1569_v53 = vpop.f32.mrb[3].mxu1 }
 0x333   :  { %v514_v54 = vmul.f32 0.2, %v510_v52  ;;  %v515_v55 = vmax.f32 %v507_v48, %v513_v51 }
 0x335   :  { %v516_v56 = vmax.f32 %v510_v52, %v514_v54  ;;  %v1791_v52 = vld [vmem:[#allocation26] sm:$0xff]   ;;  %v1792_v54 = vld [vmem:[#allocation26 + $0x8] sm:$0xff]  }
 0x337   :  { %v517_v57 = vpack.c.bf16 %v516_v56, %v515_v55  ;;  %v1793_v55 = vld [vmem:[#allocation26 + $0x10] sm:$0xff]   ;;  %v1794_v56 = vld [vmem:[#allocation26 + $0x18] sm:$0xff]  }
 0x339   :  { %1587 = vmatmul.mubr.bf16.vlgmr.msra.gmra.mrb[4].mxu0 %v517_v57  ;;  %v1795_v57 = vld [vmem:[#allocation26 + $0x20] sm:$0xff]  }
 0x33a   :  { %1626 = vmatprep.mubr.msk.bf16.mxu0 %vm2269_vm0, %v2268_v0  ;;  %1611 = vmatpush3.bf16.msra.mxu0 %v1767_v60 }
 0x33b   :  { %1612 = vmatprep.subr.bf16.mxu0 %v2268_v0 }
 0x33e   :  { %1613 = vmatpush3.bf16.msra.mxu0 %v1768_v61  ;;  %v1797_v61 = vld [vmem:[#allocation26 + $0x30] sm:$0xff]  }
 0x33f   :  { %1614 = vmatprep.subr.bf16.mxu0 %v2268_v0 }
 0x342   :  { %1615 = vmatpush3.bf16.msra.mxu0 %v1769_v62 }
 0x343   :  { %1616 = vmatprep.subr.bf16.mxu0 %v2268_v0 }
 0x346   :  { %1617 = vmatpush3.bf16.msra.mxu0 %v1770_v63 }
 0x347   :  { %1618 = vmatprep.subr.bf16.mxu0 %v2268_v0 }
 0x34a   :  { %1619 = vmatpush3.bf16.msra.mxu0 %v1771_v1 }
 0x34b   :  { %1620 = vmatprep.subr.bf16.mxu0 %v2268_v0 }
 0x34e   :  { %1621 = vmatpush3.bf16.msra.mxu0 %v1772_v2 }
 0x34f   :  { %1622 = vmatprep.subr.bf16.mxu0 %v2268_v0 }
 0x352   :  { %1623 = vmatpush3.bf16.msra.mxu0 %v1773_v11  ;;  %v1800_v11 = vld [vmem:[%s2776_s17 + $0x8] sm:$0xff]  }
 0x353   :  { %1624 = vmatprep.subr.bf16.mxu0 %v2268_v0 }
 0x356   :  { %1625 = vmatpush3.bf16.msra.mxu0 %v1774_v12  ;;  %v1801_v12 = vld [vmem:[%s2776_s17 + $0x10] sm:$0xff]  }
 0x357   :  { %1650 = vmatprep.subr.bf16.mxu0 %v2268_v0 }
 0x40c   :  { %v623_v4 = vpop.f32.mrb[4].mxu0 }
 0x40d   :  { %v1588_v5 = vpop.f32.mrb[5].mxu0  ;;  %v624_v7 = vadd.f32 %v1386_v3, %v623_v4 }
 0x40e   :  { %v626_v6 = vpop.f32.mrb[6].mxu0  ;;  %v1798_v5 = vld [vmem:[#allocation26 + $0x38] sm:$0xff]  }
 0x40f   :  { %v627_v8 = vadd.f32 %v1386_v3, %v626_v6  ;;  %v1589_v9 = vpop.f32.mrb[7].mxu0 }
 0x411   :  { %v2658_v10 = vpack.c.bf16 %v627_v8, %v624_v7 }
 0x413   :  { %1607 = vmatmul.mubr.bf16.vlgmr.msra.gmra.mrb[4].mxu1 %v2658_v10 }
 0x414   :  { %1646 = vmatprep.mubr.msk.bf16.mxu1 %vm2269_vm0, %v2268_v0  ;;  %1631 = vmatpush3.bf16.msra.mxu1 %v1783_v13  ;;  %v1802_v13 = vld [vmem:[%s2776_s17 + $0x18] sm:$0xff]  }
 0x415   :  { %1632 = vmatprep.subr.bf16.mxu1 %v2268_v0 }
 0x418   :  { %1633 = vmatpush3.bf16.msra.mxu1 %v1784_v14  ;;  %v1803_v14 = vld [vmem:[%s2776_s17 + $0x20] sm:$0xff]  }
 0x419   :  { %1634 = vmatprep.subr.bf16.mxu1 %v2268_v0 }
 0x41c   :  { %1635 = vmatpush3.bf16.msra.mxu1 %v1785_v15  ;;  %v1804_v15 = vld [vmem:[%s2776_s17 + $0x28] sm:$0xff]  }
 0x41d   :  { %1636 = vmatprep.subr.bf16.mxu1 %v2268_v0 }
 0x420   :  { %1637 = vmatpush3.bf16.msra.mxu1 %v1786_v16  ;;  %v1805_v16 = vld [vmem:[%s2776_s17 + $0x30] sm:$0xff]  }
 0x421   :  { %1638 = vmatprep.subr.bf16.mxu1 %v2268_v0 }
 0x424   :  { %1639 = vmatpush3.bf16.msra.mxu1 %v1787_v17  ;;  %v1806_v17 = vld [vmem:[%s2776_s17 + $0x38] sm:$0xff]  }
 0x425   :  { %1640 = vmatprep.subr.bf16.mxu1 %v2268_v0 }
 0x428   :  { %1641 = vmatpush3.bf16.msra.mxu1 %v1788_v18  ;;  %v1413_v18 = vld [vmem:[#allocation22] ss:$0 sm:$0xff] }
 0x429   :  { %1642 = vmatprep.subr.bf16.mxu1 %v2268_v0 }
 0x42c   :  { %1643 = vmatpush3.bf16.msra.mxu1 %v1789_v39 }
 0x42d   :  { %1644 = vmatprep.subr.bf16.mxu1 %v2268_v0 }
 0x430   :  { %1645 = vmatpush3.bf16.msra.mxu1 %v1790_v40 }
 0x431   :  { %1670 = vmatprep.subr.bf16.mxu1 %v2268_v0 }
 0x4e6   :  { %v736_v20 = vpop.f32.mrb[4].mxu1 }
 0x4e7   :  { %v737_v21 = vadd.f32 %v1395_v19, %v736_v20  ;;  %v1608_v22 = vpop.f32.mrb[5].mxu1 }
 0x4e8   :  { %v739_v23 = vpop.f32.mrb[6].mxu1 }
 0x4e9   :  { %v743_v24 = vmul.f32 0.2, %v737_v21  ;;  %v740_v25 = vadd.f32 %v1395_v19, %v739_v23  ;;  %v1609_v26 = vpop.f32.mrb[7].mxu1 }
 0x4eb   :  { %v744_v27 = vmul.f32 0.2, %v740_v25  ;;  %v745_v28 = vmax.f32 %v737_v21, %v743_v24 }
 0x4ed   :  { %v746_v29 = vmax.f32 %v740_v25, %v744_v27  ;;  %v1431_v25 = vld [vmem:[#allocation28] ss:$0 sm:$0xff] }
 0x4ef   :  { %v747_v31 = vpack.c.bf16 %v746_v29, %v745_v28 }
 0x4f1   :  { %1627 = vmatmul.mubr.bf16.vlgmr.msra.gmra.mrb[8].mxu0 %v747_v31 }
 0x4f2   :  { %1651 = vmatpush3.bf16.msra.mxu0 %v1775_v30  ;;  %1666 = vmatprep.mubr.msk.bf16.mxu0 %vm2269_vm0, %v2268_v0 }
 0x4f3   :  { %1652 = vmatprep.subr.bf16.mxu0 %v2268_v0 }
 0x4f6   :  { %1653 = vmatpush3.bf16.msra.mxu0 %v1776_v32 }
 0x4f7   :  { %1654 = vmatprep.subr.bf16.mxu0 %v2268_v0 }
 0x4fa   :  { %1655 = vmatpush3.bf16.msra.mxu0 %v1777_v33 }
 0x4fb   :  { %1656 = vmatprep.subr.bf16.mxu0 %v2268_v0 }
 0x4fe   :  { %1657 = vmatpush3.bf16.msra.mxu0 %v1778_v34 }
 0x4ff   :  { %1658 = vmatprep.subr.bf16.mxu0 %v2268_v0 }
 0x502   :  { %1659 = vmatpush3.bf16.msra.mxu0 %v1779_v35 }
 0x503   :  { %1660 = vmatprep.subr.bf16.mxu0 %v2268_v0 }
 0x506   :  { %1661 = vmatpush3.bf16.msra.mxu0 %v1780_v36 }
 0x507   :  { %1662 = vmatprep.subr.bf16.mxu0 %v2268_v0 }
 0x50a   :  { %1663 = vmatpush3.bf16.msra.mxu0 %v1781_v37 }
 0x50b   :  { %1664 = vmatprep.subr.bf16.mxu0 %v2268_v0 }
 0x50e   :  { %1665 = vmatpush3.bf16.msra.mxu0 %v1782_v38 }
 0x50f   :  { %1690 = vmatprep.subr.bf16.mxu0 %v2268_v0 }
 0x511   :  { %1667 = vmatmul.mubr.bf16.vlgmr.msra.gmra.mrb[12].mxu0 %v2658_v10  ;;  %v1799_v10 = vld [vmem:[%s2776_s17] sm:$0xff]   ;;  %s2270_s17 = smov [#allocation29]  }
 0x512   :  { %1706 = vmatprep.mubr.msk.bf16.mxu0 %vm2269_vm0, %v2268_v0  ;;  %1691 = vmatpush3.bf16.msra.mxu0 %v1799_v10  ;;  %s1332_s27 = sshll.u32 %s2270_s17, 4  ;;  %s1333_s27 = int_to_ptr.vmem [resolvable:$true] %s1332_s27 }
 0x513   :  { %1692 = vmatprep.subr.bf16.mxu0 %v2268_v0  ;;  %s2181_s9 = scalar_lea.vmem %s1333_s27, 256  ;;  %p2186_p11 = scmp.lt.s32.totalorder %s1333_s27, %s1333_s27 }
 0x514   :  { %p2182_p10 = scmp.ne.s32.totalorder %s1333_s27, %s2181_s9  ;;  %p2187_p12 = scmp.lt.s32.totalorder %s2181_s9, %s2181_s9 }
 0x516   :  { %1693 = vmatpush3.bf16.msra.mxu0 %v1800_v11  ;;  %p2188_p13 = por %p2187_p12, %p2186_p11 }
 0x517   :  { %1694 = vmatprep.subr.bf16.mxu0 %v2268_v0 }
 0x518   :  { %p2189_p0 = pnand %p2188_p13, %p2182_p10 }
 0x51a   :  { %1695 = vmatpush3.bf16.msra.mxu0 %v1801_v12 }
 0x51b   :  { %1696 = vmatprep.subr.bf16.mxu0 %v2268_v0 }
 0x51e   :  { %1697 = vmatpush3.bf16.msra.mxu0 %v1802_v13 }
 0x51f   :  { %1698 = vmatprep.subr.bf16.mxu0 %v2268_v0 }
 0x522   :  { %1699 = vmatpush3.bf16.msra.mxu0 %v1803_v14 }
 0x523   :  { %1700 = vmatprep.subr.bf16.mxu0 %v2268_v0 }
 0x526   :  { %1701 = vmatpush3.bf16.msra.mxu0 %v1804_v15 }
 0x527   :  { %1702 = vmatprep.subr.bf16.mxu0 %v2268_v0 }
 0x52a   :  { %1703 = vmatpush3.bf16.msra.mxu0 %v1805_v16 }
 0x52b   :  { %1704 = vmatprep.subr.bf16.mxu0 %v2268_v0 }
 0x52e   :  { %1705 = vmatpush3.bf16.msra.mxu0 %v1806_v17 }
 0x5c4   :  { %v853_v42 = vpop.f32.mrb[8].mxu0 }
 0x5c5   :  { %v854_v43 = vadd.f32 %v1404_v41, %v853_v42  ;;  %v1628_v44 = vpop.f32.mrb[9].mxu0 }
 0x5c6   :  { %v856_v45 = vpop.f32.mrb[10].mxu0 }
 0x5c7   :  { %v860_v46 = vmul.f32 0.2, %v854_v43  ;;  %v857_v47 = vadd.f32 %v1404_v41, %v856_v45  ;;  %v1629_v48 = vpop.f32.mrb[11].mxu0 }
 0x5c9   :  { %v861_v49 = vmul.f32 0.2, %v857_v47  ;;  %v862_v50 = vmax.f32 %v854_v43, %v860_v46 }
 0x5cb   :  { %v863_v51 = vmax.f32 %v857_v47, %v861_v49 }
 0x5cd   :  { %v864_v53 = vpack.c.bf16 %v863_v51, %v862_v50 }
 0x5cf   :  { %1647 = vmatmul.mubr.bf16.vlgmr.msra.gmra.mrb[8].mxu1 %v864_v53 }
 0x5d0   :  { %1671 = vmatpush3.bf16.msra.mxu1 %v1791_v52  ;;  %1686 = vmatprep.mubr.msk.bf16.mxu1 %vm2269_vm0, %v2268_v0 }
 0x5d1   :  { %1672 = vmatprep.subr.bf16.mxu1 %v2268_v0 }
 0x5d4   :  { %1673 = vmatpush3.bf16.msra.mxu1 %v1792_v54 }
 0x5d5   :  { %1674 = vmatprep.subr.bf16.mxu1 %v2268_v0 }
 0x5d8   :  { %1675 = vmatpush3.bf16.msra.mxu1 %v1793_v55 }
 0x5d9   :  { %1676 = vmatprep.subr.bf16.mxu1 %v2268_v0 }
 0x5dc   :  { %1677 = vmatpush3.bf16.msra.mxu1 %v1794_v56 }
 0x5dd   :  { %1678 = vmatprep.subr.bf16.mxu1 %v2268_v0 }
 0x5e0   :  { %1679 = vmatpush3.bf16.msra.mxu1 %v1795_v57 }
 0x5e1   :  { %1680 = vmatprep.subr.bf16.mxu1 %v2268_v0 }
 0x5e4   :  { %v1084_v60 = vpop.f32.mrb[12].mxu0  ;;  %1681 = vmatpush3.bf16.msra.mxu1 %v1796_v58 }
 0x5e5   :  { %v1085_v62 = vadd.f32 %v1422_v59, %v1084_v60  ;;  %v1668_v63 = vpop.f32.mrb[13].mxu0  ;;  %1682 = vmatprep.subr.bf16.mxu1 %v2268_v0 }
 0x5e6   :  { %v1087_v1 = vpop.f32.mrb[14].mxu0 }
 0x5e7   :  { %v1091_v2 = vmul.f32 0.2, %v1085_v62  ;;  %v1088_v3 = vadd.f32 %v1422_v59, %v1087_v1  ;;  %v1669_v4 = vpop.f32.mrb[15].mxu0 }
 0x5e8   :  { %1683 = vmatpush3.bf16.msra.mxu1 %v1797_v61 }
 0x5e9   :  { %v1092_v6 = vmul.f32 0.2, %v1088_v3  ;;  %1684 = vmatprep.subr.bf16.mxu1 %v2268_v0  ;;  %v1093_v7 = vmax.f32 %v1085_v62, %v1091_v2 }
 0x5eb   :  { %v1094_v8 = vmax.f32 %v1088_v3, %v1092_v6 }
 0x5ec   :  { %1685 = vmatpush3.bf16.msra.mxu1 %v1798_v5 }
 0x5ed   :  { %v1095_v9 = vpack.c.bf16 %v1094_v8, %v1093_v7 }
 0x5ef   :  { %1687 = vmatmul.mubr.bf16.vlgmr.msra.gmra.mrb[12].mxu1 %v1095_v9 }
 0x6a2   :  { %v970_v19 = vpop.f32.mrb[8].mxu1 }
 0x6a3   :  { %v971_v20 = vadd.f32 %v1413_v18, %v970_v19  ;;  %v1648_v21 = vpop.f32.mrb[9].mxu1 }
 0x6a4   :  { %v973_v22 = vpop.f32.mrb[10].mxu1 }
 0x6a5   :  { %977 = vst [vmem:[#allocation29] sm:$0xff] %v971_v20  ;;  %v974_v23 = vadd.f32 %v1413_v18, %v973_v22  ;;  %v1649_v24 = vpop.f32.mrb[11].mxu1 }
 0x6a7   :  { %978 = vst [vmem:[#allocation29 + $0x8] sm:$0xff] %v974_v23 }
 0x6c2   :  { %v1201_v26 = vpop.f32.mrb[12].mxu1 }
 0x6c3   :  { %v1202_v27 = vadd.f32 %v1431_v25, %v1201_v26  ;;  %v1688_v28 = vpop.f32.mrb[13].mxu1 }
 0x6c4   :  { %v1204_v29 = vpop.f32.mrb[14].mxu1 }
 0x6c5   :  { %v1208_v0 = vmul.f32 0.2, %v1202_v27  ;;  %v1205_v30 = vadd.f32 %v1431_v25, %v1204_v29  ;;  %v1689_v31 = vpop.f32.mrb[15].mxu1 }
 0x6c7   :  { %v1209_v32 = vmul.f32 0.2, %v1205_v30  ;;  %v1210_v33 = vmax.f32 %v1202_v27, %v1208_v0 }
 0x6c9   :  { %v1211_v34 = vmax.f32 %v1205_v30, %v1209_v32 }
 0x6cb   :  { %v1212_v35 = vpack.c.bf16 %v1211_v34, %v1210_v33 }
 0x6cd   :  { %1707 = vmatmul.mubr.bf16.vlgmr.msra.gmra.mrb[16].mxu0 %v1212_v35 }
 0x6ce   :  { %2192 = shalt.err (!%p2189_p0)
}
 0x6cf   :  { %s2800_s28 = sld [smem:[#allocation49_spill]] }
 0x6d5   :  { %s2193_s20 = scalar_lea.hbm %s2800_s28, 256 }
 0x6d6   :  { %p2194_p1 = scmp.ne.s32.totalorder %s2800_s28, %s2193_s20  ;;  %p2197_p2 = scmp.lt.u32.totalorder %s2193_s20, %s2800_s28 }
 0x6d8   :  { %p2199_p3 = pnand %p2197_p2, %p2194_p1 }
 0x6da   :  { %2202 = shalt.err (!%p2199_p3)
}
 0x6db   :  { %1338 = dma.vmem_to_hbm [thread:$0]  %s1333_s27, 256, %s2800_s28, [#allocation4], %s2258_s15, %s2258_s15, %s2259_s29  }
 0x6dc   :  { %s2801_s23 = sld [smem:[#allocation48_spill]]  ;;  %s2271_s19 = smov [#allocation30]  }
 0x6dd   :  { %s1344_s5 = sshll.u32 %s2271_s19, 4  ;;  %s1345_s5 = int_to_ptr.vmem [resolvable:$true] %s1344_s5 }
 0x6de   :  { %s2203_s11 = scalar_lea.vmem %s1345_s5, 256  ;;  %p2208_p5 = scmp.lt.s32.totalorder %s1345_s5, %s1345_s5 }
 0x6df   :  { %p2204_p4 = scmp.ne.s32.totalorder %s1345_s5, %s2203_s11  ;;  %p2209_p6 = scmp.lt.s32.totalorder %s2203_s11, %s2203_s11 }
 0x6e1   :  { %p2210_p7 = por %p2209_p6, %p2208_p5 }
 0x6e2   :  { %v1440_v36 = vld [vmem:[%s2801_s23] ss:$0 sm:$0xff] }
 0x6e3   :  { %p2211_p8 = pnand %p2210_p7, %p2204_p4 }
 0x7a0   :  { %v1318_v37 = vpop.f32.mrb[16].mxu0 }
 0x7a1   :  { %v1319_v38 = vadd.f32 %v1440_v36, %v1318_v37  ;;  %v1708_v39 = vpop.f32.mrb[17].mxu0 }
 0x7a2   :  { %v1321_v40 = vpop.f32.mrb[18].mxu0 }
 0x7a3   :  { %1325 = vst [vmem:[#allocation30] sm:$0xff] %v1319_v38  ;;  %v1322_v41 = vadd.f32 %v1440_v36, %v1321_v40  ;;  %v1709_v42 = vpop.f32.mrb[19].mxu0 }
 0x7a5   :  { %1326 = vst [vmem:[#allocation30 + $0x8] sm:$0xff] %v1322_v41 }
 0x7a6   :  { %2214 = shalt.err (!%p2211_p8)
}
 0x7a7   :  { %s2802_s25 = sld [smem:[#allocation50_spill]] }
 0x7ad   :  { %s2215_s26 = scalar_lea.hbm %s2802_s25, 256 }
 0x7ae   :  { %p2216_p9 = scmp.ne.s32.totalorder %s2802_s25, %s2215_s26  ;;  %p2219_p10 = scmp.lt.u32.totalorder %s2215_s26, %s2802_s25 }
 0x7b0   :  { %p2221_p11 = pnand %p2219_p10, %p2216_p9 }
 0x7b2   :  { %2224 = shalt.err (!%p2221_p11)
}
 0x7b3   :  { %1350 = dma.vmem_to_hbm [thread:$0]  %s1345_s5, 256, %s2802_s25, [#allocation31], %s2258_s15, %s2258_s15, %s2259_s29  }
 0x7b4   :  { %2243 = dma.done.wait [#allocation4], 256  }
 0x7b5   :  { %2244 = vsyncadd [#allocation4], 4294967040 }
 0x7b6   :  { %2245 = dma.done.wait [#allocation31], 256  }
 0x7b7   :  { %2246 = vsyncadd [#allocation31], 4294967040 }
 0x7b8   :  { %1357 = vsyncpa [#allocation3], 1 }
 0x7b9   :  { %1358 = vsyncpa [#allocation6], 1 }
 0x7ba   :  { %1359 = vsyncpa [#allocation9], 1 }
 0x7bb   :  { %1360 = vsyncpa [#allocation12], 1 }
 0x7bc   :  { %1361 = vsyncpa [#allocation15], 1 }
 0x7bd   :  { %1362 = vsyncpa [#allocation18], 1 }
 0x7be   :  { %1363 = vsyncpa [#allocation21], 1 }
 0x7bf   :  { %1364 = vsyncpa [#allocation24], 1 }
 0x7c0   :  { %1365 = vsyncpa [#allocation27], 1 }
 0x7c1   :  { %1366 = vsyncpa [#allocation4], 1 }
 0x7c2   :  { %1367 = vsyncpa [#allocation31], 1 }

</bundles_post_ra>
